<compile_context>
chip_gen: v7x
topology: tpu7x:2x2x1
jax: 0.10.0
libtpu: 0.0.40
codegen_flags: <defaults>
</compile_context>

<pallas_src>
import jax
import jax.numpy as jnp
from jax import lax
from jax.experimental import pallas as pl
from jax.experimental.pallas import tpu as pltpu


# ---------------------------------------------------------------------------
# helpers
# ---------------------------------------------------------------------------
def _round_up(x, m):
    return ((x + m - 1) // m) * m


def _pad_to(a, shape):
    pads = [(0, s - d) for d, s in zip(a.shape, shape)]
    if any(p[1] for p in pads):
        return jnp.pad(a, pads)
    return a


# ---------------------------------------------------------------------------
# Kernel 1: tiled matmul + bias   out = A @ W + b   (bf16 operands, f32 accumulation)
# Used for the fused [W_word | W_class] heads matmul.
# ---------------------------------------------------------------------------
def _matmul_bias_kernel(a_ref, w_ref, b_ref, o_ref, acc_ref):
    k = pl.program_id(2)

    @pl.when(k == 0)
    def _():
        acc_ref[...] = jnp.zeros_like(acc_ref)

    acc_ref[...] += jnp.dot(a_ref[...], w_ref[...],
                            preferred_element_type=jnp.float32)

    @pl.when(k == pl.num_programs(2) - 1)
    def _():
        o_ref[...] = (acc_ref[...] + b_ref[...]).astype(o_ref.dtype)


def _matmul_bias(a, w, b, *, tm=512, tn=1024, tk=512):
    """(M,K) @ (K,N) + (1,N); bf16 MXU operands, f32 accumulate. Returns (M, N) f32."""
    M, K = a.shape
    _, N = w.shape
    # Shrink tiles for small problems while keeping bf16-friendly (16, 128) divisibility.
    tm = min(tm, _round_up(M, 16))
    tn = min(tn, _round_up(N, 128))
    tk = min(tk, _round_up(K, 128))
    Mp, Kp, Np = _round_up(M, tm), _round_up(K, tk), _round_up(N, tn)

    a_p = _pad_to(a.astype(jnp.bfloat16), (Mp, Kp))
    w_p = _pad_to(w.astype(jnp.bfloat16), (Kp, Np))
    b_p = _pad_to(b.astype(jnp.float32).reshape(1, N), (1, Np))

    out = pl.pallas_call(
        _matmul_bias_kernel,
        out_shape=jax.ShapeDtypeStruct((Mp, Np), jnp.float32),
        grid=(Mp // tm, Np // tn, Kp // tk),
        in_specs=[
            pl.BlockSpec((tm, tk), lambda i, j, k: (i, k)),
            pl.BlockSpec((tk, tn), lambda i, j, k: (k, j)),
            pl.BlockSpec((1, tn), lambda i, j, k: (0, j)),
        ],
        out_specs=pl.BlockSpec((tm, tn), lambda i, j, k: (i, j)),
        scratch_shapes=[pltpu.VMEM((tm, tn), jnp.float32)],
        compiler_params=pltpu.CompilerParams(
            dimension_semantics=("parallel", "parallel", "arbitrary"),
            # ~9 MiB live with bf16 operands at the default tiles; cap leaves headroom on
            # v7x's 64 MiB while allowing bigger tiles on v5e/v6e's 128 MiB.
            vmem_limit_bytes=48 * 1024 * 1024),
    )(a_p, w_p, b_p)
    return out[:M, :N]


# ---------------------------------------------------------------------------
# Kernel 2: fused input-projection + RNN recurrence, streamed over time chunks.
#   phase 1 (per chunk):  out[t] = emb[t] @ W_ih + b          (independent, MXU-pipelined)
#   phase 2 (recurrence): h_t = tanh(h_{t-1} @ W_hh + out[t]); out[t] = h_t
# out_ref doubles as the xp buffer, so the projection never touches HBM separately.
# ---------------------------------------------------------------------------
def _rnn_fused_kernel(emb_ref, h0_ref, w_ih_ref, b_ref, w_hh_ref, out_ref, h_scr):
    # emb_ref:  (tT, Bblk, Ep)  bf16   time-major embedded tokens for this chunk
    # h0_ref:   (Bblk, Hp)      f32    initial hidden state for this batch block
    # w_ih_ref: (Ep, Hp)        bf16
    # b_ref:    (1, Hp)         f32    combined b_ih + b_hh
    # w_hh_ref: (Hp, Hp)        bf16
    # out_ref:  (tT, Bblk, Hp)  bf16   hidden states for this chunk (also xp staging)
    # h_scr:    (Bblk, Hp)      f32    persistent hidden-state carry across time chunks
    @pl.when(pl.program_id(1) == 0)
    def _():
        h_scr[...] = h0_ref[...]

    tT = emb_ref.shape[0]
    bias = b_ref[...]

    def proj(t, carry):
        out_ref[t] = (jnp.dot(emb_ref[t], w_ih_ref[...],
                              preferred_element_type=jnp.float32)
                      + bias).astype(out_ref.dtype)
        return carry

    lax.fori_loop(0, tT, proj, 0, unroll=8)

    # TODO(synk): weight-stationary W_hh (pltpu.matmul_push_rhs / matmul_acc_lhs) would cut the
    # per-step RHS streaming cost on the serial critical path; kept jnp.dot for robust lowering.
    def step(t, h):
        h_new = jnp.tanh(
            jnp.dot(h.astype(jnp.bfloat16), w_hh_ref[...],
                    preferred_element_type=jnp.float32)
            + out_ref[t].astype(jnp.float32))
        out_ref[t] = h_new.astype(out_ref.dtype)
        return h_new

    h_scr[...] = lax.fori_loop(0, tT, step, h_scr[...], unroll=8)


# ---------------------------------------------------------------------------
# Wrapper (forward pass)
# ---------------------------------------------------------------------------
@jax.jit
def small_language_model_forward(x, hidden, params):
    """x: (B, T) int32 tokens, hidden: (1, B, H). Returns (word_logits, class_logits, hidden)."""
    emb_table = params["embedding"]                    # (V, E)
    w_ih, w_hh, b_rnn = params["w_ih"], params["w_hh"], params["b_rnn"]
    w_word, b_word = params["w_word"], params["b_word"]
    w_class, b_class = params["w_class"], params["b_class"]

    B, T = x.shape
    V, E = emb_table.shape
    H = w_hh.shape[0]
    C = w_class.shape[1]

    Bp = _round_up(B, 16)                              # sublane padding (bf16-packed)
    Ep = _round_up(E, 128)                             # lane padding
    Hp = _round_up(H, 128)
    tT = min(128, _round_up(T, 8))                     # time chunk streamed through the RNN kernel
    Tp = _round_up(T, tT)

    # Embedding gather, produced directly time-major (T, B, E) in bf16.
    # TODO(synk): could be fused into the RNN kernel via PrefetchScalarGridSpec + pl.Element.
    emb_p = _pad_to(emb_table, (V, Ep)).astype(jnp.bfloat16)
    embedded_tm = jnp.take(emb_p, x.T, axis=0)         # (T, B, Ep) bf16
    embedded_tm = _pad_to(embedded_tm, (Tp, Bp, Ep))   # (Tp, Bp, Ep)

    w_ih_p = _pad_to(w_ih, (Ep, Hp)).astype(jnp.bfloat16)
    w_hh_p = _pad_to(w_hh, (Hp, Hp)).astype(jnp.bfloat16)
    b_rnn_p = _pad_to(b_rnn.reshape(1, H), (1, Hp)).astype(jnp.float32)
    h0_p = _pad_to(hidden[0], (Bp, Hp)).astype(jnp.float32)

    # Optional batch-block split so v7x's second TensorCore gets half the batch (no-op otherwise).
    nB = 2 if (Bp % 32 == 0) else 1
    Bblk = Bp // nB

    out_tm = pl.pallas_call(
        _rnn_fused_kernel,
        out_shape=jax.ShapeDtypeStruct((Tp, Bp, Hp), jnp.bfloat16),
        grid=(nB, Tp // tT),
        in_specs=[
            pl.BlockSpec((tT, Bblk, Ep), lambda b, t: (t, b, 0)),
            pl.BlockSpec((Bblk, Hp), lambda b, t: (b, 0)),
            pl.BlockSpec((Ep, Hp), lambda b, t: (0, 0)),
            pl.BlockSpec((1, Hp), lambda b, t: (0, 0)),
            pl.BlockSpec((Hp, Hp), lambda b, t: (0, 0)),
        ],
        out_specs=pl.BlockSpec((tT, Bblk, Hp), lambda b, t: (t, b, 0)),
        scratch_shapes=[pltpu.VMEM((Bblk, Hp), jnp.float32)],
        compiler_params=pltpu.CompilerParams(
            dimension_semantics=("parallel", "arbitrary")),
    )(embedded_tm, h0_p, w_ih_p, b_rnn_p, w_hh_p)

    # Final hidden state = real last timestep (padded time/batch rows are never used).
    h_final = out_tm[T - 1, :B, :H].astype(jnp.float32)          # (B, H)

    # Fused, lane-dense heads over [W_word | W_class]; transpose the SMALL (T,B,H) activations
    # to batch-major before the matmul so the large logits tensor never moves afterwards.
    w_heads = _pad_to(jnp.concatenate([w_word, w_class], axis=1), (Hp, V + C))
    b_heads = jnp.concatenate([b_word.reshape(1, V), b_class.reshape(1, C)], axis=1)

    out_bm = jnp.transpose(out_tm[:T, :B], (1, 0, 2)).reshape(B * T, Hp)   # (B*T, Hp) bf16
    logits = _matmul_bias(out_bm, w_heads, b_heads)              # (B*T, V+C) f32
    logits = logits.reshape(B, T, V + C)

    word_logits = logits[..., :V]
    class_logits = logits[..., V:]
    return word_logits, class_logits, h_final[None]              # hidden as (1, B, H)


# ---------------------------------------------------------------------------
# Pure-JAX reference for verification (f32 everywhere)
# ---------------------------------------------------------------------------
def reference_forward(x, hidden, params):
    hi = lax.Precision.HIGHEST
    emb = jnp.take(params["embedding"], x, axis=0)     # (B, T, E)
    h = hidden[0]                                      # (B, H)
    outs = []
    for t in range(x.shape[1]):
        h = jnp.tanh(jnp.dot(emb[:, t, :], params["w_ih"], precision=hi)
                     + jnp.dot(h, params["w_hh"], precision=hi)
                     + params["b_rnn"])
        outs.append(h)
    out = jnp.stack(outs, axis=1)                      # (B, T, H)
    word = jnp.dot(out, params["w_word"], precision=hi) + params["b_word"]
    cls = jnp.dot(out, params["w_class"], precision=hi) + params["b_class"]
    return word, cls, h[None]


def init_params(key, vocab_size, class_size, embedding_dim, hidden_dim):
    ks = jax.random.split(key, 8)
    scale = 0.1
    return {
        "embedding": scale * jax.random.normal(ks[0], (vocab_size, embedding_dim), jnp.float32),
        "w_ih":      scale * jax.random.normal(ks[1], (embedding_dim, hidden_dim), jnp.float32),
        "w_hh":      scale * jax.random.normal(ks[2], (hidden_dim, hidden_dim), jnp.float32),
        # combined b_ih + b_hh of torch.nn.RNN, kept 2D (1, H)
        "b_rnn":     scale * jax.random.normal(ks[3], (1, hidden_dim), jnp.float32),
        "w_word":    scale * jax.random.normal(ks[4], (hidden_dim, vocab_size), jnp.float32),
        "b_word":    scale * jax.random.normal(ks[5], (1, vocab_size), jnp.float32),
        "w_class":   scale * jax.random.normal(ks[6], (hidden_dim, class_size), jnp.float32),
        "b_class":   scale * jax.random.normal(ks[7], (1, class_size), jnp.float32),
    }


if __name__ == "__main__":
    vocab_size, class_size, embedding_dim, hidden_dim = 64, 8, 16, 32
    batch, seq = 2, 8

    key = jax.random.PRNGKey(0)
    k_params, k_tokens = jax.random.split(key)
    params = init_params(k_params, vocab_size, class_size, embedding_dim, hidden_dim)

    x = jax.random.randint(k_tokens, (batch, seq), 0, vocab_size, dtype=jnp.int32)
    hidden = jnp.zeros((1, batch, hidden_dim), jnp.float32)   # init_hidden equivalent

    word_logits, class_logits, h_out = small_language_model_forward(x, hidden, params)
    jax.block_until_ready((word_logits, class_logits, h_out))

    w_ref, c_ref, h_ref = reference_forward(x, hidden, params)
    assert word_logits.shape == (batch, seq, vocab_size)
    assert class_logits.shape == (batch, seq, class_size)
    assert h_out.shape == (1, batch, hidden_dim)
    # bf16 MXU operands (f32 accumulation) vs f32 reference -> loosened tolerance.
    assert jnp.allclose(word_logits, w_ref, atol=2e-2, rtol=2e-2)
    assert jnp.allclose(class_logits, c_ref, atol=2e-2, rtol=2e-2)
    assert jnp.allclose(h_out, h_ref, atol=2e-2, rtol=2e-2)

    print("KERNEL_OK")
</pallas_src>

<mosaic_0001>
module attributes {stable_mosaic.version = 11 : i64} {
  func.func @_rnn_fused_kernel(%arg0: i32, %arg1: i32, %arg2: memref<8x16x128xbf16, #tpu.memory_space<vmem>>, %arg3: memref<16x128xf32, #tpu.memory_space<vmem>>, %arg4: memref<128x128xbf16, #tpu.memory_space<vmem>>, %arg5: memref<1x128xf32, #tpu.memory_space<vmem>>, %arg6: memref<128x128xbf16, #tpu.memory_space<vmem>>, %arg7: memref<8x16x128xbf16, #tpu.memory_space<vmem>>, %arg8: memref<16x128xf32, #tpu.memory_space<vmem>>) attributes {dimension_semantics = [#tpu.dimension_semantics<parallel>, #tpu.dimension_semantics<arbitrary>], iteration_bounds = array<i64: 1, 1>, scalar_prefetch = 0 : i64, scratch_operands = 1 : i64, tpu.core_type = #tpu.core_type<tc>, window_params = [{transform_indices = @transform_0, window_bounds = array<i64: 8, 16, 128>}, {transform_indices = @transform_1, window_bounds = array<i64: 16, 128>}, {pipeline_mode = #tpu.pipeline_mode<synchronous>, transform_indices = @transform_2, window_bounds = array<i64: 128, 128>}, {pipeline_mode = #tpu.pipeline_mode<synchronous>, transform_indices = @transform_3, window_bounds = array<i64: 1, 128>}, {pipeline_mode = #tpu.pipeline_mode<synchronous>, transform_indices = @transform_4, window_bounds = array<i64: 128, 128>}, {transform_indices = @transform_5, window_bounds = array<i64: 8, 16, 128>}]} {
    %c0_i32 = arith.constant 0 : i32
    %0 = arith.cmpi eq, %arg1, %c0_i32 : i32
    %1 = arith.extui %0 : i1 to i32
    %c0_i32_0 = arith.constant 0 : i32
    %2 = arith.cmpi ne, %1, %c0_i32_0 : i32
    scf.if %2 {
      %c0_127 = arith.constant 0 : index
      %c0_128 = arith.constant 0 : index
      %214 = vector.load %arg3[%c0_127, %c0_128] : memref<16x128xf32, #tpu.memory_space<vmem>>, vector<16x128xf32>
      %c0_129 = arith.constant 0 : index
      %c0_130 = arith.constant 0 : index
      %215 = vector.load %arg8[%c0_129, %c0_130] : memref<16x128xf32, #tpu.memory_space<vmem>>, vector<16x128xf32>
      tpu.vector_store %arg8[%c0_129, %c0_130], %214 {strides = array<i32>} : memref<16x128xf32, #tpu.memory_space<vmem>>, vector<16x128xf32>,
    } else {
    }
    %c0 = arith.constant 0 : index
    %c0_1 = arith.constant 0 : index
    %3 = vector.load %arg5[%c0, %c0_1] : memref<1x128xf32, #tpu.memory_space<vmem>>, vector<1x128xf32>
    %c0_i32_2 = arith.constant 0 : i32
    %4 = arith.index_cast %c0_i32_2 : i32 to index
    %c0_3 = arith.constant 0 : index
    %c0_4 = arith.constant 0 : index
    %5 = vector.load %arg2[%4, %c0_3, %c0_4] : memref<8x16x128xbf16, #tpu.memory_space<vmem>>, vector<1x16x128xbf16>
    %6 = vector.shape_cast %5 : vector<1x16x128xbf16> to vector<16x128xbf16>
    %c0_5 = arith.constant 0 : index
    %c0_6 = arith.constant 0 : index
    %7 = vector.load %arg4[%c0_5, %c0_6] : memref<128x128xbf16, #tpu.memory_space<vmem>>, vector<128x128xbf16>
    %cst = arith.constant dense<0.000000e+00> : vector<16x128xf32>
    %8 = tpu.matmul %6, %7, %cst {dimension_numbers = #tpu.dot_dimension_numbers<[1], [0], [0], [1], [0, 0, 1, 1], [], []>} : vector<16x128xbf16>, vector<128x128xbf16>, vector<16x128xf32> -> vector<16x128xf32>
    %9 = vector.broadcast %3 : vector<1x128xf32> to vector<16x128xf32>
    %10 = arith.addf %8, %9 : vector<16x128xf32>
    %11 = arith.truncf %10 : vector<16x128xf32> to vector<16x128xbf16>
    %12 = arith.index_cast %c0_i32_2 : i32 to index
    %c0_7 = arith.constant 0 : index
    %c0_8 = arith.constant 0 : index
    %13 = vector.load %arg7[%12, %c0_7, %c0_8] : memref<8x16x128xbf16, #tpu.memory_space<vmem>>, vector<1x16x128xbf16>
    %14 = vector.shape_cast %13 : vector<1x16x128xbf16> to vector<16x128xbf16>
    %15 = vector.shape_cast %11 : vector<16x128xbf16> to vector<1x16x128xbf16>
    tpu.vector_store %arg7[%12, %c0_7, %c0_8], %15 {strides = array<i32>} : memref<8x16x128xbf16, #tpu.memory_space<vmem>>, vector<1x16x128xbf16>,
    %c1_i32 = arith.constant 1 : i32
    %16 = arith.index_cast %c1_i32 : i32 to index
    %c0_9 = arith.constant 0 : index
    %c0_10 = arith.constant 0 : index
    %17 = vector.load %arg2[%16, %c0_9, %c0_10] : memref<8x16x128xbf16, #tpu.memory_space<vmem>>, vector<1x16x128xbf16>
    %18 = vector.shape_cast %17 : vector<1x16x128xbf16> to vector<16x128xbf16>
    %c0_11 = arith.constant 0 : index
    %c0_12 = arith.constant 0 : index
    %19 = vector.load %arg4[%c0_11, %c0_12] : memref<128x128xbf16, #tpu.memory_space<vmem>>, vector<128x128xbf16>
    %cst_13 = arith.constant dense<0.000000e+00> : vector<16x128xf32>
    %20 = tpu.matmul %18, %19, %cst_13 {dimension_numbers = #tpu.dot_dimension_numbers<[1], [0], [0], [1], [0, 0, 1, 1], [], []>} : vector<16x128xbf16>, vector<128x128xbf16>, vector<16x128xf32> -> vector<16x128xf32>
    %21 = vector.broadcast %3 : vector<1x128xf32> to vector<16x128xf32>
    %22 = arith.addf %20, %21 : vector<16x128xf32>
    %23 = arith.truncf %22 : vector<16x128xf32> to vector<16x128xbf16>
    %24 = arith.index_cast %c1_i32 : i32 to index
    %c0_14 = arith.constant 0 : index
    %c0_15 = arith.constant 0 : index
    %25 = vector.load %arg7[%24, %c0_14, %c0_15] : memref<8x16x128xbf16, #tpu.memory_space<vmem>>, vector<1x16x128xbf16>
    %26 = vector.shape_cast %25 : vector<1x16x128xbf16> to vector<16x128xbf16>
    %27 = vector.shape_cast %23 : vector<16x128xbf16> to vector<1x16x128xbf16>
    tpu.vector_store %arg7[%24, %c0_14, %c0_15], %27 {strides = array<i32>} : memref<8x16x128xbf16, #tpu.memory_space<vmem>>, vector<1x16x128xbf16>,
    %c2_i32 = arith.constant 2 : i32
    %28 = arith.index_cast %c2_i32 : i32 to index
    %c0_16 = arith.constant 0 : index
    %c0_17 = arith.constant 0 : index
    %29 = vector.load %arg2[%28, %c0_16, %c0_17] : memref<8x16x128xbf16, #tpu.memory_space<vmem>>, vector<1x16x128xbf16>
    %30 = vector.shape_cast %29 : vector<1x16x128xbf16> to vector<16x128xbf16>
    %c0_18 = arith.constant 0 : index
    %c0_19 = arith.constant 0 : index
    %31 = vector.load %arg4[%c0_18, %c0_19] : memref<128x128xbf16, #tpu.memory_space<vmem>>, vector<128x128xbf16>
    %cst_20 = arith.constant dense<0.000000e+00> : vector<16x128xf32>
    %32 = tpu.matmul %30, %31, %cst_20 {dimension_numbers = #tpu.dot_dimension_numbers<[1], [0], [0], [1], [0, 0, 1, 1], [], []>} : vector<16x128xbf16>, vector<128x128xbf16>, vector<16x128xf32> -> vector<16x128xf32>
    %33 = vector.broadcast %3 : vector<1x128xf32> to vector<16x128xf32>
    %34 = arith.addf %32, %33 : vector<16x128xf32>
    %35 = arith.truncf %34 : vector<16x128xf32> to vector<16x128xbf16>
    %36 = arith.index_cast %c2_i32 : i32 to index
    %c0_21 = arith.constant 0 : index
    %c0_22 = arith.constant 0 : index
    %37 = vector.load %arg7[%36, %c0_21, %c0_22] : memref<8x16x128xbf16, #tpu.memory_space<vmem>>, vector<1x16x128xbf16>
    %38 = vector.shape_cast %37 : vector<1x16x128xbf16> to vector<16x128xbf16>
    %39 = vector.shape_cast %35 : vector<16x128xbf16> to vector<1x16x128xbf16>
    tpu.vector_store %arg7[%36, %c0_21, %c0_22], %39 {strides = array<i32>} : memref<8x16x128xbf16, #tpu.memory_space<vmem>>, vector<1x16x128xbf16>,
    %c3_i32 = arith.constant 3 : i32
    %40 = arith.index_cast %c3_i32 : i32 to index
    %c0_23 = arith.constant 0 : index
    %c0_24 = arith.constant 0 : index
    %41 = vector.load %arg2[%40, %c0_23, %c0_24] : memref<8x16x128xbf16, #tpu.memory_space<vmem>>, vector<1x16x128xbf16>
    %42 = vector.shape_cast %41 : vector<1x16x128xbf16> to vector<16x128xbf16>
    %c0_25 = arith.constant 0 : index
    %c0_26 = arith.constant 0 : index
    %43 = vector.load %arg4[%c0_25, %c0_26] : memref<128x128xbf16, #tpu.memory_space<vmem>>, vector<128x128xbf16>
    %cst_27 = arith.constant dense<0.000000e+00> : vector<16x128xf32>
    %44 = tpu.matmul %42, %43, %cst_27 {dimension_numbers = #tpu.dot_dimension_numbers<[1], [0], [0], [1], [0, 0, 1, 1], [], []>} : vector<16x128xbf16>, vector<128x128xbf16>, vector<16x128xf32> -> vector<16x128xf32>
    %45 = vector.broadcast %3 : vector<1x128xf32> to vector<16x128xf32>
    %46 = arith.addf %44, %45 : vector<16x128xf32>
    %47 = arith.truncf %46 : vector<16x128xf32> to vector<16x128xbf16>
    %48 = arith.index_cast %c3_i32 : i32 to index
    %c0_28 = arith.constant 0 : index
    %c0_29 = arith.constant 0 : index
    %49 = vector.load %arg7[%48, %c0_28, %c0_29] : memref<8x16x128xbf16, #tpu.memory_space<vmem>>, vector<1x16x128xbf16>
    %50 = vector.shape_cast %49 : vector<1x16x128xbf16> to vector<16x128xbf16>
    %51 = vector.shape_cast %47 : vector<16x128xbf16> to vector<1x16x128xbf16>
    tpu.vector_store %arg7[%48, %c0_28, %c0_29], %51 {strides = array<i32>} : memref<8x16x128xbf16, #tpu.memory_space<vmem>>, vector<1x16x128xbf16>,
    %c4_i32 = arith.constant 4 : i32
    %52 = arith.index_cast %c4_i32 : i32 to index
    %c0_30 = arith.constant 0 : index
    %c0_31 = arith.constant 0 : index
    %53 = vector.load %arg2[%52, %c0_30, %c0_31] : memref<8x16x128xbf16, #tpu.memory_space<vmem>>, vector<1x16x128xbf16>
    %54 = vector.shape_cast %53 : vector<1x16x128xbf16> to vector<16x128xbf16>
    %c0_32 = arith.constant 0 : index
    %c0_33 = arith.constant 0 : index
    %55 = vector.load %arg4[%c0_32, %c0_33] : memref<128x128xbf16, #tpu.memory_space<vmem>>, vector<128x128xbf16>
    %cst_34 = arith.constant dense<0.000000e+00> : vector<16x128xf32>
    %56 = tpu.matmul %54, %55, %cst_34 {dimension_numbers = #tpu.dot_dimension_numbers<[1], [0], [0], [1], [0, 0, 1, 1], [], []>} : vector<16x128xbf16>, vector<128x128xbf16>, vector<16x128xf32> -> vector<16x128xf32>
    %57 = vector.broadcast %3 : vector<1x128xf32> to vector<16x128xf32>
    %58 = arith.addf %56, %57 : vector<16x128xf32>
    %59 = arith.truncf %58 : vector<16x128xf32> to vector<16x128xbf16>
    %60 = arith.index_cast %c4_i32 : i32 to index
    %c0_35 = arith.constant 0 : index
    %c0_36 = arith.constant 0 : index
    %61 = vector.load %arg7[%60, %c0_35, %c0_36] : memref<8x16x128xbf16, #tpu.memory_space<vmem>>, vector<1x16x128xbf16>
    %62 = vector.shape_cast %61 : vector<1x16x128xbf16> to vector<16x128xbf16>
    %63 = vector.shape_cast %59 : vector<16x128xbf16> to vector<1x16x128xbf16>
    tpu.vector_store %arg7[%60, %c0_35, %c0_36], %63 {strides = array<i32>} : memref<8x16x128xbf16, #tpu.memory_space<vmem>>, vector<1x16x128xbf16>,
    %c5_i32 = arith.constant 5 : i32
    %64 = arith.index_cast %c5_i32 : i32 to index
    %c0_37 = arith.constant 0 : index
    %c0_38 = arith.constant 0 : index
    %65 = vector.load %arg2[%64, %c0_37, %c0_38] : memref<8x16x128xbf16, #tpu.memory_space<vmem>>, vector<1x16x128xbf16>
    %66 = vector.shape_cast %65 : vector<1x16x128xbf16> to vector<16x128xbf16>
    %c0_39 = arith.constant 0 : index
    %c0_40 = arith.constant 0 : index
    %67 = vector.load %arg4[%c0_39, %c0_40] : memref<128x128xbf16, #tpu.memory_space<vmem>>, vector<128x128xbf16>
    %cst_41 = arith.constant dense<0.000000e+00> : vector<16x128xf32>
    %68 = tpu.matmul %66, %67, %cst_41 {dimension_numbers = #tpu.dot_dimension_numbers<[1], [0], [0], [1], [0, 0, 1, 1], [], []>} : vector<16x128xbf16>, vector<128x128xbf16>, vector<16x128xf32> -> vector<16x128xf32>
    %69 = vector.broadcast %3 : vector<1x128xf32> to vector<16x128xf32>
    %70 = arith.addf %68, %69 : vector<16x128xf32>
    %71 = arith.truncf %70 : vector<16x128xf32> to vector<16x128xbf16>
    %72 = arith.index_cast %c5_i32 : i32 to index
    %c0_42 = arith.constant 0 : index
    %c0_43 = arith.constant 0 : index
    %73 = vector.load %arg7[%72, %c0_42, %c0_43] : memref<8x16x128xbf16, #tpu.memory_space<vmem>>, vector<1x16x128xbf16>
    %74 = vector.shape_cast %73 : vector<1x16x128xbf16> to vector<16x128xbf16>
    %75 = vector.shape_cast %71 : vector<16x128xbf16> to vector<1x16x128xbf16>
    tpu.vector_store %arg7[%72, %c0_42, %c0_43], %75 {strides = array<i32>} : memref<8x16x128xbf16, #tpu.memory_space<vmem>>, vector<1x16x128xbf16>,
    %c6_i32 = arith.constant 6 : i32
    %76 = arith.index_cast %c6_i32 : i32 to index
    %c0_44 = arith.constant 0 : index
    %c0_45 = arith.constant 0 : index
    %77 = vector.load %arg2[%76, %c0_44, %c0_45] : memref<8x16x128xbf16, #tpu.memory_space<vmem>>, vector<1x16x128xbf16>
    %78 = vector.shape_cast %77 : vector<1x16x128xbf16> to vector<16x128xbf16>
    %c0_46 = arith.constant 0 : index
    %c0_47 = arith.constant 0 : index
    %79 = vector.load %arg4[%c0_46, %c0_47] : memref<128x128xbf16, #tpu.memory_space<vmem>>, vector<128x128xbf16>
    %cst_48 = arith.constant dense<0.000000e+00> : vector<16x128xf32>
    %80 = tpu.matmul %78, %79, %cst_48 {dimension_numbers = #tpu.dot_dimension_numbers<[1], [0], [0], [1], [0, 0, 1, 1], [], []>} : vector<16x128xbf16>, vector<128x128xbf16>, vector<16x128xf32> -> vector<16x128xf32>
    %81 = vector.broadcast %3 : vector<1x128xf32> to vector<16x128xf32>
    %82 = arith.addf %80, %81 : vector<16x128xf32>
    %83 = arith.truncf %82 : vector<16x128xf32> to vector<16x128xbf16>
    %84 = arith.index_cast %c6_i32 : i32 to index
    %c0_49 = arith.constant 0 : index
    %c0_50 = arith.constant 0 : index
    %85 = vector.load %arg7[%84, %c0_49, %c0_50] : memref<8x16x128xbf16, #tpu.memory_space<vmem>>, vector<1x16x128xbf16>
    %86 = vector.shape_cast %85 : vector<1x16x128xbf16> to vector<16x128xbf16>
    %87 = vector.shape_cast %83 : vector<16x128xbf16> to vector<1x16x128xbf16>
    tpu.vector_store %arg7[%84, %c0_49, %c0_50], %87 {strides = array<i32>} : memref<8x16x128xbf16, #tpu.memory_space<vmem>>, vector<1x16x128xbf16>,
    %c7_i32 = arith.constant 7 : i32
    %88 = arith.index_cast %c7_i32 : i32 to index
    %c0_51 = arith.constant 0 : index
    %c0_52 = arith.constant 0 : index
    %89 = vector.load %arg2[%88, %c0_51, %c0_52] : memref<8x16x128xbf16, #tpu.memory_space<vmem>>, vector<1x16x128xbf16>
    %90 = vector.shape_cast %89 : vector<1x16x128xbf16> to vector<16x128xbf16>
    %c0_53 = arith.constant 0 : index
    %c0_54 = arith.constant 0 : index
    %91 = vector.load %arg4[%c0_53, %c0_54] : memref<128x128xbf16, #tpu.memory_space<vmem>>, vector<128x128xbf16>
    %cst_55 = arith.constant dense<0.000000e+00> : vector<16x128xf32>
    %92 = tpu.matmul %90, %91, %cst_55 {dimension_numbers = #tpu.dot_dimension_numbers<[1], [0], [0], [1], [0, 0, 1, 1], [], []>} : vector<16x128xbf16>, vector<128x128xbf16>, vector<16x128xf32> -> vector<16x128xf32>
    %93 = vector.broadcast %3 : vector<1x128xf32> to vector<16x128xf32>
    %94 = arith.addf %92, %93 : vector<16x128xf32>
    %95 = arith.truncf %94 : vector<16x128xf32> to vector<16x128xbf16>
    %96 = arith.index_cast %c7_i32 : i32 to index
    %c0_56 = arith.constant 0 : index
    %c0_57 = arith.constant 0 : index
    %97 = vector.load %arg7[%96, %c0_56, %c0_57] : memref<8x16x128xbf16, #tpu.memory_space<vmem>>, vector<1x16x128xbf16>
    %98 = vector.shape_cast %97 : vector<1x16x128xbf16> to vector<16x128xbf16>
    %99 = vector.shape_cast %95 : vector<16x128xbf16> to vector<1x16x128xbf16>
    tpu.vector_store %arg7[%96, %c0_56, %c0_57], %99 {strides = array<i32>} : memref<8x16x128xbf16, #tpu.memory_space<vmem>>, vector<1x16x128xbf16>,
    %c8_i32 = arith.constant 8 : i32
    %c0_58 = arith.constant 0 : index
    %c0_59 = arith.constant 0 : index
    %100 = vector.load %arg8[%c0_58, %c0_59] : memref<16x128xf32, #tpu.memory_space<vmem>>, vector<16x128xf32>
    %c0_i32_60 = arith.constant 0 : i32
    %101 = arith.truncf %100 : vector<16x128xf32> to vector<16x128xbf16>
    %c0_61 = arith.constant 0 : index
    %c0_62 = arith.constant 0 : index
    %102 = vector.load %arg6[%c0_61, %c0_62] : memref<128x128xbf16, #tpu.memory_space<vmem>>, vector<128x128xbf16>
    %cst_63 = arith.constant dense<0.000000e+00> : vector<16x128xf32>
    %103 = tpu.matmul %101, %102, %cst_63 {dimension_numbers = #tpu.dot_dimension_numbers<[1], [0], [0], [1], [0, 0, 1, 1], [], []>} : vector<16x128xbf16>, vector<128x128xbf16>, vector<16x128xf32> -> vector<16x128xf32>
    %104 = arith.index_cast %c0_i32_60 : i32 to index
    %c0_64 = arith.constant 0 : index
    %c0_65 = arith.constant 0 : index
    %105 = vector.load %arg7[%104, %c0_64, %c0_65] : memref<8x16x128xbf16, #tpu.memory_space<vmem>>, vector<1x16x128xbf16>
    %106 = vector.shape_cast %105 : vector<1x16x128xbf16> to vector<16x128xbf16>
    %107 = arith.extf %106 : vector<16x128xbf16> to vector<16x128xf32>
    %108 = arith.addf %103, %107 : vector<16x128xf32>
    %109 = math.tanh %108 : vector<16x128xf32>
    %110 = arith.truncf %109 : vector<16x128xf32> to vector<16x128xbf16>
    %111 = arith.index_cast %c0_i32_60 : i32 to index
    %c0_66 = arith.constant 0 : index
    %c0_67 = arith.constant 0 : index
    %112 = vector.load %arg7[%111, %c0_66, %c0_67] : memref<8x16x128xbf16, #tpu.memory_space<vmem>>, vector<1x16x128xbf16>
    %113 = vector.shape_cast %112 : vector<1x16x128xbf16> to vector<16x128xbf16>
    %114 = vector.shape_cast %110 : vector<16x128xbf16> to vector<1x16x128xbf16>
    tpu.vector_store %arg7[%111, %c0_66, %c0_67], %114 {strides = array<i32>} : memref<8x16x128xbf16, #tpu.memory_space<vmem>>, vector<1x16x128xbf16>,
    %c1_i32_68 = arith.constant 1 : i32
    %115 = arith.truncf %109 : vector<16x128xf32> to vector<16x128xbf16>
    %c0_69 = arith.constant 0 : index
    %c0_70 = arith.constant 0 : index
    %116 = vector.load %arg6[%c0_69, %c0_70] : memref<128x128xbf16, #tpu.memory_space<vmem>>, vector<128x128xbf16>
    %cst_71 = arith.constant dense<0.000000e+00> : vector<16x128xf32>
    %117 = tpu.matmul %115, %116, %cst_71 {dimension_numbers = #tpu.dot_dimension_numbers<[1], [0], [0], [1], [0, 0, 1, 1], [], []>} : vector<16x128xbf16>, vector<128x128xbf16>, vector<16x128xf32> -> vector<16x128xf32>
    %118 = arith.index_cast %c1_i32_68 : i32 to index
    %c0_72 = arith.constant 0 : index
    %c0_73 = arith.constant 0 : index
    %119 = vector.load %arg7[%118, %c0_72, %c0_73] : memref<8x16x128xbf16, #tpu.memory_space<vmem>>, vector<1x16x128xbf16>
    %120 = vector.shape_cast %119 : vector<1x16x128xbf16> to vector<16x128xbf16>
    %121 = arith.extf %120 : vector<16x128xbf16> to vector<16x128xf32>
    %122 = arith.addf %117, %121 : vector<16x128xf32>
    %123 = math.tanh %122 : vector<16x128xf32>
    %124 = arith.truncf %123 : vector<16x128xf32> to vector<16x128xbf16>
    %125 = arith.index_cast %c1_i32_68 : i32 to index
    %c0_74 = arith.constant 0 : index
    %c0_75 = arith.constant 0 : index
    %126 = vector.load %arg7[%125, %c0_74, %c0_75] : memref<8x16x128xbf16, #tpu.memory_space<vmem>>, vector<1x16x128xbf16>
    %127 = vector.shape_cast %126 : vector<1x16x128xbf16> to vector<16x128xbf16>
    %128 = vector.shape_cast %124 : vector<16x128xbf16> to vector<1x16x128xbf16>
    tpu.vector_store %arg7[%125, %c0_74, %c0_75], %128 {strides = array<i32>} : memref<8x16x128xbf16, #tpu.memory_space<vmem>>, vector<1x16x128xbf16>,
    %c2_i32_76 = arith.constant 2 : i32
    %129 = arith.truncf %123 : vector<16x128xf32> to vector<16x128xbf16>
    %c0_77 = arith.constant 0 : index
    %c0_78 = arith.constant 0 : index
    %130 = vector.load %arg6[%c0_77, %c0_78] : memref<128x128xbf16, #tpu.memory_space<vmem>>, vector<128x128xbf16>
    %cst_79 = arith.constant dense<0.000000e+00> : vector<16x128xf32>
    %131 = tpu.matmul %129, %130, %cst_79 {dimension_numbers = #tpu.dot_dimension_numbers<[1], [0], [0], [1], [0, 0, 1, 1], [], []>} : vector<16x128xbf16>, vector<128x128xbf16>, vector<16x128xf32> -> vector<16x128xf32>
    %132 = arith.index_cast %c2_i32_76 : i32 to index
    %c0_80 = arith.constant 0 : index
    %c0_81 = arith.constant 0 : index
    %133 = vector.load %arg7[%132, %c0_80, %c0_81] : memref<8x16x128xbf16, #tpu.memory_space<vmem>>, vector<1x16x128xbf16>
    %134 = vector.shape_cast %133 : vector<1x16x128xbf16> to vector<16x128xbf16>
    %135 = arith.extf %134 : vector<16x128xbf16> to vector<16x128xf32>
    %136 = arith.addf %131, %135 : vector<16x128xf32>
    %137 = math.tanh %136 : vector<16x128xf32>
    %138 = arith.truncf %137 : vector<16x128xf32> to vector<16x128xbf16>
    %139 = arith.index_cast %c2_i32_76 : i32 to index
    %c0_82 = arith.constant 0 : index
    %c0_83 = arith.constant 0 : index
    %140 = vector.load %arg7[%139, %c0_82, %c0_83] : memref<8x16x128xbf16, #tpu.memory_space<vmem>>, vector<1x16x128xbf16>
    %141 = vector.shape_cast %140 : vector<1x16x128xbf16> to vector<16x128xbf16>
    %142 = vector.shape_cast %138 : vector<16x128xbf16> to vector<1x16x128xbf16>
    tpu.vector_store %arg7[%139, %c0_82, %c0_83], %142 {strides = array<i32>} : memref<8x16x128xbf16, #tpu.memory_space<vmem>>, vector<1x16x128xbf16>,
    %c3_i32_84 = arith.constant 3 : i32
    %143 = arith.truncf %137 : vector<16x128xf32> to vector<16x128xbf16>
    %c0_85 = arith.constant 0 : index
    %c0_86 = arith.constant 0 : index
    %144 = vector.load %arg6[%c0_85, %c0_86] : memref<128x128xbf16, #tpu.memory_space<vmem>>, vector<128x128xbf16>
    %cst_87 = arith.constant dense<0.000000e+00> : vector<16x128xf32>
    %145 = tpu.matmul %143, %144, %cst_87 {dimension_numbers = #tpu.dot_dimension_numbers<[1], [0], [0], [1], [0, 0, 1, 1], [], []>} : vector<16x128xbf16>, vector<128x128xbf16>, vector<16x128xf32> -> vector<16x128xf32>
    %146 = arith.index_cast %c3_i32_84 : i32 to index
    %c0_88 = arith.constant 0 : index
    %c0_89 = arith.constant 0 : index
    %147 = vector.load %arg7[%146, %c0_88, %c0_89] : memref<8x16x128xbf16, #tpu.memory_space<vmem>>, vector<1x16x128xbf16>
    %148 = vector.shape_cast %147 : vector<1x16x128xbf16> to vector<16x128xbf16>
    %149 = arith.extf %148 : vector<16x128xbf16> to vector<16x128xf32>
    %150 = arith.addf %145, %149 : vector<16x128xf32>
    %151 = math.tanh %150 : vector<16x128xf32>
    %152 = arith.truncf %151 : vector<16x128xf32> to vector<16x128xbf16>
    %153 = arith.index_cast %c3_i32_84 : i32 to index
    %c0_90 = arith.constant 0 : index
    %c0_91 = arith.constant 0 : index
    %154 = vector.load %arg7[%153, %c0_90, %c0_91] : memref<8x16x128xbf16, #tpu.memory_space<vmem>>, vector<1x16x128xbf16>
    %155 = vector.shape_cast %154 : vector<1x16x128xbf16> to vector<16x128xbf16>
    %156 = vector.shape_cast %152 : vector<16x128xbf16> to vector<1x16x128xbf16>
    tpu.vector_store %arg7[%153, %c0_90, %c0_91], %156 {strides = array<i32>} : memref<8x16x128xbf16, #tpu.memory_space<vmem>>, vector<1x16x128xbf16>,
    %c4_i32_92 = arith.constant 4 : i32
    %157 = arith.truncf %151 : vector<16x128xf32> to vector<16x128xbf16>
    %c0_93 = arith.constant 0 : index
    %c0_94 = arith.constant 0 : index
    %158 = vector.load %arg6[%c0_93, %c0_94] : memref<128x128xbf16, #tpu.memory_space<vmem>>, vector<128x128xbf16>
    %cst_95 = arith.constant dense<0.000000e+00> : vector<16x128xf32>
    %159 = tpu.matmul %157, %158, %cst_95 {dimension_numbers = #tpu.dot_dimension_numbers<[1], [0], [0], [1], [0, 0, 1, 1], [], []>} : vector<16x128xbf16>, vector<128x128xbf16>, vector<16x128xf32> -> vector<16x128xf32>
    %160 = arith.index_cast %c4_i32_92 : i32 to index
    %c0_96 = arith.constant 0 : index
    %c0_97 = arith.constant 0 : index
    %161 = vector.load %arg7[%160, %c0_96, %c0_97] : memref<8x16x128xbf16, #tpu.memory_space<vmem>>, vector<1x16x128xbf16>
    %162 = vector.shape_cast %161 : vector<1x16x128xbf16> to vector<16x128xbf16>
    %163 = arith.extf %162 : vector<16x128xbf16> to vector<16x128xf32>
    %164 = arith.addf %159, %163 : vector<16x128xf32>
    %165 = math.tanh %164 : vector<16x128xf32>
    %166 = arith.truncf %165 : vector<16x128xf32> to vector<16x128xbf16>
    %167 = arith.index_cast %c4_i32_92 : i32 to index
    %c0_98 = arith.constant 0 : index
    %c0_99 = arith.constant 0 : index
    %168 = vector.load %arg7[%167, %c0_98, %c0_99] : memref<8x16x128xbf16, #tpu.memory_space<vmem>>, vector<1x16x128xbf16>
    %169 = vector.shape_cast %168 : vector<1x16x128xbf16> to vector<16x128xbf16>
    %170 = vector.shape_cast %166 : vector<16x128xbf16> to vector<1x16x128xbf16>
    tpu.vector_store %arg7[%167, %c0_98, %c0_99], %170 {strides = array<i32>} : memref<8x16x128xbf16, #tpu.memory_space<vmem>>, vector<1x16x128xbf16>,
    %c5_i32_100 = arith.constant 5 : i32
    %171 = arith.truncf %165 : vector<16x128xf32> to vector<16x128xbf16>
    %c0_101 = arith.constant 0 : index
    %c0_102 = arith.constant 0 : index
    %172 = vector.load %arg6[%c0_101, %c0_102] : memref<128x128xbf16, #tpu.memory_space<vmem>>, vector<128x128xbf16>
    %cst_103 = arith.constant dense<0.000000e+00> : vector<16x128xf32>
    %173 = tpu.matmul %171, %172, %cst_103 {dimension_numbers = #tpu.dot_dimension_numbers<[1], [0], [0], [1], [0, 0, 1, 1], [], []>} : vector<16x128xbf16>, vector<128x128xbf16>, vector<16x128xf32> -> vector<16x128xf32>
    %174 = arith.index_cast %c5_i32_100 : i32 to index
    %c0_104 = arith.constant 0 : index
    %c0_105 = arith.constant 0 : index
    %175 = vector.load %arg7[%174, %c0_104, %c0_105] : memref<8x16x128xbf16, #tpu.memory_space<vmem>>, vector<1x16x128xbf16>
    %176 = vector.shape_cast %175 : vector<1x16x128xbf16> to vector<16x128xbf16>
    %177 = arith.extf %176 : vector<16x128xbf16> to vector<16x128xf32>
    %178 = arith.addf %173, %177 : vector<16x128xf32>
    %179 = math.tanh %178 : vector<16x128xf32>
    %180 = arith.truncf %179 : vector<16x128xf32> to vector<16x128xbf16>
    %181 = arith.index_cast %c5_i32_100 : i32 to index
    %c0_106 = arith.constant 0 : index
    %c0_107 = arith.constant 0 : index
    %182 = vector.load %arg7[%181, %c0_106, %c0_107] : memref<8x16x128xbf16, #tpu.memory_space<vmem>>, vector<1x16x128xbf16>
    %183 = vector.shape_cast %182 : vector<1x16x128xbf16> to vector<16x128xbf16>
    %184 = vector.shape_cast %180 : vector<16x128xbf16> to vector<1x16x128xbf16>
    tpu.vector_store %arg7[%181, %c0_106, %c0_107], %184 {strides = array<i32>} : memref<8x16x128xbf16, #tpu.memory_space<vmem>>, vector<1x16x128xbf16>,
    %c6_i32_108 = arith.constant 6 : i32
    %185 = arith.truncf %179 : vector<16x128xf32> to vector<16x128xbf16>
    %c0_109 = arith.constant 0 : index
    %c0_110 = arith.constant 0 : index
    %186 = vector.load %arg6[%c0_109, %c0_110] : memref<128x128xbf16, #tpu.memory_space<vmem>>, vector<128x128xbf16>
    %cst_111 = arith.constant dense<0.000000e+00> : vector<16x128xf32>
    %187 = tpu.matmul %185, %186, %cst_111 {dimension_numbers = #tpu.dot_dimension_numbers<[1], [0], [0], [1], [0, 0, 1, 1], [], []>} : vector<16x128xbf16>, vector<128x128xbf16>, vector<16x128xf32> -> vector<16x128xf32>
    %188 = arith.index_cast %c6_i32_108 : i32 to index
    %c0_112 = arith.constant 0 : index
    %c0_113 = arith.constant 0 : index
    %189 = vector.load %arg7[%188, %c0_112, %c0_113] : memref<8x16x128xbf16, #tpu.memory_space<vmem>>, vector<1x16x128xbf16>
    %190 = vector.shape_cast %189 : vector<1x16x128xbf16> to vector<16x128xbf16>
    %191 = arith.extf %190 : vector<16x128xbf16> to vector<16x128xf32>
    %192 = arith.addf %187, %191 : vector<16x128xf32>
    %193 = math.tanh %192 : vector<16x128xf32>
    %194 = arith.truncf %193 : vector<16x128xf32> to vector<16x128xbf16>
    %195 = arith.index_cast %c6_i32_108 : i32 to index
    %c0_114 = arith.constant 0 : index
    %c0_115 = arith.constant 0 : index
    %196 = vector.load %arg7[%195, %c0_114, %c0_115] : memref<8x16x128xbf16, #tpu.memory_space<vmem>>, vector<1x16x128xbf16>
    %197 = vector.shape_cast %196 : vector<1x16x128xbf16> to vector<16x128xbf16>
    %198 = vector.shape_cast %194 : vector<16x128xbf16> to vector<1x16x128xbf16>
    tpu.vector_store %arg7[%195, %c0_114, %c0_115], %198 {strides = array<i32>} : memref<8x16x128xbf16, #tpu.memory_space<vmem>>, vector<1x16x128xbf16>,
    %c7_i32_116 = arith.constant 7 : i32
    %199 = arith.truncf %193 : vector<16x128xf32> to vector<16x128xbf16>
    %c0_117 = arith.constant 0 : index
    %c0_118 = arith.constant 0 : index
    %200 = vector.load %arg6[%c0_117, %c0_118] : memref<128x128xbf16, #tpu.memory_space<vmem>>, vector<128x128xbf16>
    %cst_119 = arith.constant dense<0.000000e+00> : vector<16x128xf32>
    %201 = tpu.matmul %199, %200, %cst_119 {dimension_numbers = #tpu.dot_dimension_numbers<[1], [0], [0], [1], [0, 0, 1, 1], [], []>} : vector<16x128xbf16>, vector<128x128xbf16>, vector<16x128xf32> -> vector<16x128xf32>
    %202 = arith.index_cast %c7_i32_116 : i32 to index
    %c0_120 = arith.constant 0 : index
    %c0_121 = arith.constant 0 : index
    %203 = vector.load %arg7[%202, %c0_120, %c0_121] : memref<8x16x128xbf16, #tpu.memory_space<vmem>>, vector<1x16x128xbf16>
    %204 = vector.shape_cast %203 : vector<1x16x128xbf16> to vector<16x128xbf16>
    %205 = arith.extf %204 : vector<16x128xbf16> to vector<16x128xf32>
    %206 = arith.addf %201, %205 : vector<16x128xf32>
    %207 = math.tanh %206 : vector<16x128xf32>
    %208 = arith.truncf %207 : vector<16x128xf32> to vector<16x128xbf16>
    %209 = arith.index_cast %c7_i32_116 : i32 to index
    %c0_122 = arith.constant 0 : index
    %c0_123 = arith.constant 0 : index
    %210 = vector.load %arg7[%209, %c0_122, %c0_123] : memref<8x16x128xbf16, #tpu.memory_space<vmem>>, vector<1x16x128xbf16>
    %211 = vector.shape_cast %210 : vector<1x16x128xbf16> to vector<16x128xbf16>
    %212 = vector.shape_cast %208 : vector<16x128xbf16> to vector<1x16x128xbf16>
    tpu.vector_store %arg7[%209, %c0_122, %c0_123], %212 {strides = array<i32>} : memref<8x16x128xbf16, #tpu.memory_space<vmem>>, vector<1x16x128xbf16>,
    %c8_i32_124 = arith.constant 8 : i32
    %c0_125 = arith.constant 0 : index
    %c0_126 = arith.constant 0 : index
    %213 = vector.load %arg8[%c0_125, %c0_126] : memref<16x128xf32, #tpu.memory_space<vmem>>, vector<16x128xf32>
    tpu.vector_store %arg8[%c0_125, %c0_126], %207 {strides = array<i32>} : memref<16x128xf32, #tpu.memory_space<vmem>>, vector<16x128xf32>,
    return
  }
  func.func @transform_0(%arg0: i32, %arg1: i32) -> (i32, i32, i32) {
    %c0_i32 = arith.constant 0 : i32
    %c0_i32_0 = arith.constant 0 : i32
    return %arg1, %arg0, %c0_i32 : i32, i32, i32
  }
  func.func @transform_1(%arg0: i32, %arg1: i32) -> (i32, i32) {
    %c0_i32 = arith.constant 0 : i32
    %c0_i32_0 = arith.constant 0 : i32
    return %arg0, %c0_i32 : i32, i32
  }
  func.func @transform_2(%arg0: i32, %arg1: i32) -> (i32, i32) {
    %c0_i32 = arith.constant 0 : i32
    %c0_i32_0 = arith.constant 0 : i32
    %c0_i32_1 = arith.constant 0 : i32
    return %c0_i32, %c0_i32_0 : i32, i32
  }
  func.func @transform_3(%arg0: i32, %arg1: i32) -> (i32, i32) {
    %c0_i32 = arith.constant 0 : i32
    %c0_i32_0 = arith.constant 0 : i32
    %c0_i32_1 = arith.constant 0 : i32
    return %c0_i32, %c0_i32_0 : i32, i32
  }
  func.func @transform_4(%arg0: i32, %arg1: i32) -> (i32, i32) {
    %c0_i32 = arith.constant 0 : i32
    %c0_i32_0 = arith.constant 0 : i32
    %c0_i32_1 = arith.constant 0 : i32
    return %c0_i32, %c0_i32_0 : i32, i32
  }
  func.func @transform_5(%arg0: i32, %arg1: i32) -> (i32, i32, i32) {
    %c0_i32 = arith.constant 0 : i32
    %c0_i32_0 = arith.constant 0 : i32
    return %arg1, %arg0, %c0_i32 : i32, i32, i32
  }
}

module attributes {stable_mosaic.version = 11 : i64} {
  func.func @_matmul_bias_kernel(%arg0: i32, %arg1: i32, %arg2: i32, %arg3: memref<16x128xbf16, #tpu.memory_space<vmem>>, %arg4: memref<128x128xbf16, #tpu.memory_space<vmem>>, %arg5: memref<1x128xf32, #tpu.memory_space<vmem>>, %arg6: memref<16x128xf32, #tpu.memory_space<vmem>>, %arg7: memref<16x128xf32, #tpu.memory_space<vmem>>) attributes {dimension_semantics = [#tpu.dimension_semantics<parallel>, #tpu.dimension_semantics<parallel>, #tpu.dimension_semantics<arbitrary>], iteration_bounds = array<i64: 1, 1, 1>, scalar_prefetch = 0 : i64, scratch_operands = 1 : i64, tpu.core_type = #tpu.core_type<tc>, window_params = [{transform_indices = @transform_0, window_bounds = array<i64: 16, 128>}, {transform_indices = @transform_1, window_bounds = array<i64: 128, 128>}, {transform_indices = @transform_2, window_bounds = array<i64: 1, 128>}, {transform_indices = @transform_3, window_bounds = array<i64: 16, 128>}]} {
    %c0_i32 = arith.constant 0 : i32
    %0 = arith.cmpi eq, %arg2, %c0_i32 : i32
    %1 = arith.extui %0 : i1 to i32
    %c0_i32_0 = arith.constant 0 : i32
    %2 = arith.cmpi ne, %1, %c0_i32_0 : i32
    scf.if %2 {
      %cst_10 = arith.constant 0.000000e+00 : f32
      %12 = vector.broadcast %cst_10 : f32 to vector<16x128xf32>
      %c0_11 = arith.constant 0 : index
      %c0_12 = arith.constant 0 : index
      %13 = vector.load %arg7[%c0_11, %c0_12] : memref<16x128xf32, #tpu.memory_space<vmem>>, vector<16x128xf32>
      tpu.vector_store %arg7[%c0_11, %c0_12], %12 {strides = array<i32>} : memref<16x128xf32, #tpu.memory_space<vmem>>, vector<16x128xf32>,
    } else {
    }
    %c0 = arith.constant 0 : index
    %c0_1 = arith.constant 0 : index
    %3 = vector.load %arg7[%c0, %c0_1] : memref<16x128xf32, #tpu.memory_space<vmem>>, vector<16x128xf32>
    %c0_2 = arith.constant 0 : index
    %c0_3 = arith.constant 0 : index
    %4 = vector.load %arg3[%c0_2, %c0_3] : memref<16x128xbf16, #tpu.memory_space<vmem>>, vector<16x128xbf16>
    %c0_4 = arith.constant 0 : index
    %c0_5 = arith.constant 0 : index
    %5 = vector.load %arg4[%c0_4, %c0_5] : memref<128x128xbf16, #tpu.memory_space<vmem>>, vector<128x128xbf16>
    %cst = arith.constant dense<0.000000e+00> : vector<16x128xf32>
    %6 = tpu.matmul %4, %5, %cst {dimension_numbers = #tpu.dot_dimension_numbers<[1], [0], [0], [1], [0, 0, 1, 1], [], []>} : vector<16x128xbf16>, vector<128x128xbf16>, vector<16x128xf32> -> vector<16x128xf32>
    %7 = arith.addf %3, %6 : vector<16x128xf32>
    %c0_6 = arith.constant 0 : index
    %c0_7 = arith.constant 0 : index
    %8 = vector.load %arg7[%c0_6, %c0_7] : memref<16x128xf32, #tpu.memory_space<vmem>>, vector<16x128xf32>
    tpu.vector_store %arg7[%c0_6, %c0_7], %7 {strides = array<i32>} : memref<16x128xf32, #tpu.memory_space<vmem>>, vector<16x128xf32>,
    %c0_i32_8 = arith.constant 0 : i32
    %9 = arith.cmpi eq, %arg2, %c0_i32_8 : i32
    %10 = arith.extui %9 : i1 to i32
    %c0_i32_9 = arith.constant 0 : i32
    %11 = arith.cmpi ne, %10, %c0_i32_9 : i32
    scf.if %11 {
      %c0_10 = arith.constant 0 : index
      %c0_11 = arith.constant 0 : index
      %12 = vector.load %arg7[%c0_10, %c0_11] : memref<16x128xf32, #tpu.memory_space<vmem>>, vector<16x128xf32>
      %c0_12 = arith.constant 0 : index
      %c0_13 = arith.constant 0 : index
      %13 = vector.load %arg5[%c0_12, %c0_13] : memref<1x128xf32, #tpu.memory_space<vmem>>, vector<1x128xf32>
      %14 = vector.broadcast %13 : vector<1x128xf32> to vector<16x128xf32>
      %15 = arith.addf %12, %14 : vector<16x128xf32>
      %c0_14 = arith.constant 0 : index
      %c0_15 = arith.constant 0 : index
      %16 = vector.load %arg6[%c0_14, %c0_15] : memref<16x128xf32, #tpu.memory_space<vmem>>, vector<16x128xf32>
      tpu.vector_store %arg6[%c0_14, %c0_15], %15 {strides = array<i32>} : memref<16x128xf32, #tpu.memory_space<vmem>>, vector<16x128xf32>,
    } else {
    }
    return
  }
  func.func @transform_0(%arg0: i32, %arg1: i32, %arg2: i32) -> (i32, i32) {
    %c0_i32 = arith.constant 0 : i32
    return %arg0, %arg2 : i32, i32
  }
  func.func @transform_1(%arg0: i32, %arg1: i32, %arg2: i32) -> (i32, i32) {
    %c0_i32 = arith.constant 0 : i32
    return %arg2, %arg1 : i32, i32
  }
  func.func @transform_2(%arg0: i32, %arg1: i32, %arg2: i32) -> (i32, i32) {
    %c0_i32 = arith.constant 0 : i32
    %c0_i32_0 = arith.constant 0 : i32
    return %c0_i32, %arg1 : i32, i32
  }
  func.func @transform_3(%arg0: i32, %arg1: i32, %arg2: i32) -> (i32, i32) {
    %c0_i32 = arith.constant 0 : i32
    return %arg0, %arg1 : i32, i32
  }
}

</mosaic_0001>

<bundles_post_ra>
// kernel: small_language_model_forward.3
= control target key start
LH: loop header
LB: loop body
LE: loop exit
PB: predicated region body
PF: predicated region fallthrough
CT: control target
= control target key end

     0   :  { %v210_v0 = vmov 0.0   ;;  %vm211_vm0 = vmmov 0   ;;  %s268_s1 = inlined_call_operand.vmem [shape: bf16[128,128], index: 1, kind: input, shape index: {}]   ;;  %s269_s0 = inlined_call_operand.vmem [shape: bf16[16,128], index: 0, kind: input, shape index: {}]   ;;  %s270_s2 = inlined_call_operand.vmem [shape: f32[1,128], index: 2, kind: input, shape index: {}]   ;;  %s271_s3 = inlined_call_operand.vmem [shape: f32[16,128], index: 3, kind: output, shape index: {}]  }
   0x1   :  { %179 = vmatprep.subr.bf16.mxu0 %v210_v0  ;;  %v201_v1 = vld [vmem:[%s268_s1] sm:$0xff]   ;;  %195 = vmatprep.mubr.msk.bf16.mxu0 %vm211_vm0, %v210_v0  ;;  %v202_v2 = vld [vmem:[%s268_s1 + $0x8] sm:$0xff]   ;;  %v203_v3 = vld [vmem:[%s268_s1 + $0x10] sm:$0xff]  }
   0x2   :  { %180 = vmatpush3.bf16.msra.mxu0 %v201_v1  ;;  %v204_v4 = vld [vmem:[%s268_s1 + $0x18] sm:$0xff]   ;;  %v205_v5 = vld [vmem:[%s268_s1 + $0x20] sm:$0xff]   ;;  %v206_v6 = vld [vmem:[%s268_s1 + $0x28] sm:$0xff]  }
   0x3   :  { %181 = vmatprep.subr.bf16.mxu0 %v210_v0  ;;  %v207_v7 = vld [vmem:[%s268_s1 + $0x30] sm:$0xff]   ;;  %v208_v8 = vld [vmem:[%s268_s1 + $0x38] sm:$0xff]   ;;  %v209_v9 = vld [vmem:[%s269_s0] sm:$0xff]  }
   0x4   :  { %v169_v10 = vld [vmem:[%s270_s2] ss:$0 sm:$0xff] }
   0x6   :  { %182 = vmatpush3.bf16.msra.mxu0 %v202_v2 }
   0x7   :  { %183 = vmatprep.subr.bf16.mxu0 %v210_v0 }
   0xa   :  { %184 = vmatpush3.bf16.msra.mxu0 %v203_v3 }
   0xb   :  { %185 = vmatprep.subr.bf16.mxu0 %v210_v0 }
   0xe   :  { %186 = vmatpush3.bf16.msra.mxu0 %v204_v4 }
   0xf   :  { %187 = vmatprep.subr.bf16.mxu0 %v210_v0 }
  0x12   :  { %188 = vmatpush3.bf16.msra.mxu0 %v205_v5 }
  0x13   :  { %189 = vmatprep.subr.bf16.mxu0 %v210_v0 }
  0x16   :  { %190 = vmatpush3.bf16.msra.mxu0 %v206_v6 }
  0x17   :  { %191 = vmatprep.subr.bf16.mxu0 %v210_v0 }
  0x1a   :  { %192 = vmatpush3.bf16.msra.mxu0 %v207_v7 }
  0x1b   :  { %193 = vmatprep.subr.bf16.mxu0 %v210_v0 }
  0x1e   :  { %194 = vmatpush3.bf16.msra.mxu0 %v208_v8 }
  0x21   :  { %196 = vmatmul.mubr.bf16.vlgmr.msra.gmra.mrb[0].mxu0 %v209_v9 }
  0xf4   :  { %v129_v11 = vpop.f32.mrb[0].mxu0 }
  0xf5   :  { %v152_v12 = vadd.f32 %v169_v10, %v129_v11  ;;  %v197_v13 = vpop.f32.mrb[1].mxu0 }
  0xf6   :  { %v132_v14 = vpop.f32.mrb[2].mxu0 }
  0xf7   :  { %154 = vst [vmem:[%s271_s3] sm:$0xff] %v152_v12  ;;  %v153_v15 = vadd.f32 %v169_v10, %v132_v14  ;;  %v198_v16 = vpop.f32.mrb[3].mxu0 }
  0xf9   :  { %155 = vst [vmem:[%s271_s3 + $0x8] sm:$0xff] %v153_v15 }

// kernel: small_language_model_forward.2
= control target key start
LH: loop header
LB: loop body
LE: loop exit
PB: predicated region body
PF: predicated region fallthrough
CT: control target
= control target key end

     0   :  { %v3035_v0 = vmov 0.0   ;;  %vm3036_vm0 = vmmov 0   ;;  %s3714_s2 = inlined_call_operand.vmem [shape: bf16[128,128], index: 2, kind: input, shape index: {}]   ;;  %s3715_s0 = inlined_call_operand.vmem [shape: bf16[8,16,128], index: 0, kind: input, shape index: {}]   ;;  %s3716_s4 = inlined_call_operand.vmem [shape: bf16[128,128], index: 4, kind: input, shape index: {}]   ;;  %s3717_s1 = inlined_call_operand.vmem [shape: f32[16,128], index: 1, kind: input, shape index: {}]   ;;  %s3718_s3 = inlined_call_operand.vmem [shape: f32[1,128], index: 3, kind: input, shape index: {}]   ;;  %s3719_s5 = inlined_call_operand.vmem [shape: bf16[8,16,128], index: 5, kind: output, shape index: {}]  }
   0x1   :  { %2545 = vmatprep.subr.bf16.mxu0 %v3035_v0  ;;  %v2867_v1 = vld [vmem:[%s3714_s2] sm:$0xff]   ;;  %2561 = vmatprep.mubr.msk.bf16.mxu0 %vm3036_vm0, %v3035_v0  ;;  %v2868_v2 = vld [vmem:[%s3714_s2 + $0x8] sm:$0xff]   ;;  %v2869_v3 = vld [vmem:[%s3714_s2 + $0x10] sm:$0xff]  }
   0x2   :  { %2565 = vmatprep.subr.bf16.mxu1 %v3035_v0  ;;  %2581 = vmatprep.mubr.msk.bf16.mxu1 %vm3036_vm0, %v3035_v0  ;;  %v2870_v4 = vld [vmem:[%s3714_s2 + $0x18] sm:$0xff]   ;;  %v2871_v5 = vld [vmem:[%s3714_s2 + $0x20] sm:$0xff]   ;;  %v2872_v6 = vld [vmem:[%s3714_s2 + $0x28] sm:$0xff]  }
   0x3   :  { %2546 = vmatpush3.bf16.msra.mxu0 %v2867_v1  ;;  %v2873_v7 = vld [vmem:[%s3714_s2 + $0x30] sm:$0xff]   ;;  %v2874_v8 = vld [vmem:[%s3714_s2 + $0x38] sm:$0xff]   ;;  %v2875_v9 = vld [vmem:[%s3715_s0] sm:$0xff]  }
   0x4   :  { %2547 = vmatprep.subr.bf16.mxu0 %v3035_v0  ;;  %v2876_v10 = vld [vmem:[%s3714_s2] sm:$0xff]   ;;  %v2877_v11 = vld [vmem:[%s3714_s2 + $0x8] sm:$0xff]   ;;  %v2878_v12 = vld [vmem:[%s3714_s2 + $0x10] sm:$0xff]  }
   0x5   :  { %v2879_v13 = vld [vmem:[%s3714_s2 + $0x18] sm:$0xff]   ;;  %v2911_v14 = vld [vmem:[%s3714_s2] sm:$0xff]   ;;  %v2912_v16 = vld [vmem:[%s3714_s2 + $0x8] sm:$0xff]  }
   0x6   :  { %v2880_v15 = vld [vmem:[%s3714_s2 + $0x20] sm:$0xff]   ;;  %2566 = vmatpush3.bf16.msra.mxu1 %v2911_v14  ;;  %v2881_v17 = vld [vmem:[%s3714_s2 + $0x28] sm:$0xff]   ;;  %v2913_v18 = vld [vmem:[%s3714_s2 + $0x10] sm:$0xff]  }
   0x7   :  { %2548 = vmatpush3.bf16.msra.mxu0 %v2868_v2  ;;  %2567 = vmatprep.subr.bf16.mxu1 %v3035_v0  ;;  %v2882_v19 = vld [vmem:[%s3714_s2 + $0x30] sm:$0xff]   ;;  %v2914_v20 = vld [vmem:[%s3714_s2 + $0x18] sm:$0xff]   ;;  %v2885_v23 = vld [vmem:[%s3714_s2] sm:$0xff]  }
   0x8   :  { %2549 = vmatprep.subr.bf16.mxu0 %v3035_v0  ;;  %v2883_v21 = vld [vmem:[%s3714_s2 + $0x38] sm:$0xff]   ;;  %v2884_v22 = vld [vmem:[%s3715_s0 + $0x10] sm:$0xff]   ;;  %v2886_v24 = vld [vmem:[%s3714_s2 + $0x8] sm:$0xff]  }
   0x9   :  { %v2887_v25 = vld [vmem:[%s3714_s2 + $0x10] sm:$0xff]   ;;  %v2888_v26 = vld [vmem:[%s3714_s2 + $0x18] sm:$0xff]   ;;  %v2889_v27 = vld [vmem:[%s3714_s2 + $0x20] sm:$0xff]  }
   0xa   :  { %2568 = vmatpush3.bf16.msra.mxu1 %v2912_v16  ;;  %v2890_v28 = vld [vmem:[%s3714_s2 + $0x28] sm:$0xff]   ;;  %v2891_v29 = vld [vmem:[%s3714_s2 + $0x30] sm:$0xff]   ;;  %v2892_v30 = vld [vmem:[%s3714_s2 + $0x38] sm:$0xff]  }
   0xb   :  { %2550 = vmatpush3.bf16.msra.mxu0 %v2869_v3  ;;  %2569 = vmatprep.subr.bf16.mxu1 %v3035_v0  ;;  %v2893_v31 = vld [vmem:[%s3715_s0 + $0x20] sm:$0xff]   ;;  %v2895_v33 = vld [vmem:[%s3714_s2 + $0x8] sm:$0xff]   ;;  %v2896_v34 = vld [vmem:[%s3714_s2 + $0x10] sm:$0xff]  }
   0xc   :  { %2551 = vmatprep.subr.bf16.mxu0 %v3035_v0  ;;  %v2894_v32 = vld [vmem:[%s3714_s2] sm:$0xff]   ;;  %v2897_v35 = vld [vmem:[%s3714_s2 + $0x18] sm:$0xff]   ;;  %v2899_v37 = vld [vmem:[%s3714_s2 + $0x28] sm:$0xff]  }
   0xd   :  { %v2898_v36 = vld [vmem:[%s3714_s2 + $0x20] sm:$0xff]   ;;  %v2900_v39 = vld [vmem:[%s3714_s2 + $0x30] sm:$0xff]   ;;  %v2916_v40 = vld [vmem:[%s3714_s2 + $0x28] sm:$0xff]  }
   0xe   :  { %2570 = vmatpush3.bf16.msra.mxu1 %v2913_v18  ;;  %v2915_v38 = vld [vmem:[%s3714_s2 + $0x20] sm:$0xff]   ;;  %v2917_v41 = vld [vmem:[%s3714_s2 + $0x30] sm:$0xff]   ;;  %v2901_v42 = vld [vmem:[%s3714_s2 + $0x38] sm:$0xff]  }
   0xf   :  { %2552 = vmatpush3.bf16.msra.mxu0 %v2870_v4  ;;  %2571 = vmatprep.subr.bf16.mxu1 %v3035_v0  ;;  %v2902_v43 = vld [vmem:[%s3715_s0 + $0x30] sm:$0xff]   ;;  %v2918_v44 = vld [vmem:[%s3714_s2 + $0x38] sm:$0xff]   ;;  %v2903_v45 = vld [vmem:[%s3716_s4] sm:$0xff]  }
  0x10   :  { %2553 = vmatprep.subr.bf16.mxu0 %v3035_v0  ;;  %v2919_v46 = vld [vmem:[%s3715_s0 + $0x8] sm:$0xff]   ;;  %v2920_v47 = vld [vmem:[%s3714_s2] sm:$0xff]   ;;  %v2905_v50 = vld [vmem:[%s3716_s4 + $0x10] sm:$0xff]  }
  0x11   :  { %v2904_v48 = vld [vmem:[%s3716_s4 + $0x8] sm:$0xff]   ;;  %v2922_v51 = vld [vmem:[%s3714_s2 + $0x10] sm:$0xff]   ;;  %v2906_v52 = vld [vmem:[%s3716_s4 + $0x18] sm:$0xff]  }
  0x12   :  { %2572 = vmatpush3.bf16.msra.mxu1 %v2914_v20  ;;  %v2921_v49 = vld [vmem:[%s3714_s2 + $0x8] sm:$0xff]   ;;  %v2923_v53 = vld [vmem:[%s3714_s2 + $0x18] sm:$0xff]   ;;  %v2907_v54 = vld [vmem:[%s3716_s4 + $0x20] sm:$0xff]  }
  0x13   :  { %2554 = vmatpush3.bf16.msra.mxu0 %v2871_v5  ;;  %2573 = vmatprep.subr.bf16.mxu1 %v3035_v0  ;;  %v2908_v55 = vld [vmem:[%s3716_s4 + $0x28] sm:$0xff]   ;;  %v2924_v56 = vld [vmem:[%s3714_s2 + $0x20] sm:$0xff]   ;;  %v2909_v57 = vld [vmem:[%s3716_s4 + $0x30] sm:$0xff]  }
  0x14   :  { %2555 = vmatprep.subr.bf16.mxu0 %v3035_v0  ;;  %v2925_v58 = vld [vmem:[%s3714_s2 + $0x28] sm:$0xff]   ;;  %v2926_v59 = vld [vmem:[%s3714_s2 + $0x30] sm:$0xff]   ;;  %v2910_v60 = vld [vmem:[%s3716_s4 + $0x38] sm:$0xff]  }
  0x15   :  { %v25_v61 = vld [vmem:[%s3717_s1] sm:$0xff]  ;;  %v26_v62 = vld [vmem:[%s3717_s1 + $0x8] sm:$0xff]  ;;  %v2927_v1 = vld [vmem:[%s3714_s2 + $0x38] sm:$0xff]  }
  0x16   :  { %2574 = vmatpush3.bf16.msra.mxu1 %v2915_v38  ;;  %v1036_v63 = vpack.c.bf16 %v26_v62, %v25_v61  ;;  %v2928_v2 = vld [vmem:[%s3715_s0 + $0x18] sm:$0xff]   ;;  %v2929_v3 = vld [vmem:[%s3714_s2] sm:$0xff]   ;;  %v2930_v4 = vld [vmem:[%s3714_s2 + $0x8] sm:$0xff]  }
  0x17   :  { %2556 = vmatpush3.bf16.msra.mxu0 %v2872_v6  ;;  %2575 = vmatprep.subr.bf16.mxu1 %v3035_v0  ;;  %v2931_v5 = vld [vmem:[%s3714_s2 + $0x10] sm:$0xff]   ;;  %v2932_v6 = vld [vmem:[%s3714_s2 + $0x18] sm:$0xff]   ;;  %v2942_v16 = vld [vmem:[%s3714_s2 + $0x20] sm:$0xff]  }
  0x18   :  { %2557 = vmatprep.subr.bf16.mxu0 %v3035_v0  ;;  %v2940_v14 = vld [vmem:[%s3714_s2 + $0x10] sm:$0xff]   ;;  %v2946_v20 = vld [vmem:[%s3715_s0 + $0x38] sm:$0xff]  }
  0x19   :  { %v2944_v18 = vld [vmem:[%s3714_s2 + $0x30] sm:$0xff]  }
  0x1a   :  { %2576 = vmatpush3.bf16.msra.mxu1 %v2916_v40 }
  0x1b   :  { %2558 = vmatpush3.bf16.msra.mxu0 %v2873_v7  ;;  %2577 = vmatprep.subr.bf16.mxu1 %v3035_v0  ;;  %v2933_v7 = vld [vmem:[%s3714_s2 + $0x20] sm:$0xff]  }
  0x1c   :  { %2559 = vmatprep.subr.bf16.mxu0 %v3035_v0 }
  0x1e   :  { %2578 = vmatpush3.bf16.msra.mxu1 %v2917_v41 }
  0x1f   :  { %2560 = vmatpush3.bf16.msra.mxu0 %v2874_v8  ;;  %2579 = vmatprep.subr.bf16.mxu1 %v3035_v0  ;;  %v2934_v8 = vld [vmem:[%s3714_s2 + $0x28] sm:$0xff]  }
  0x20   :  { %2585 = vmatprep.subr.bf16.mxu0 %v3035_v0 }
  0x22   :  { %2562 = vmatmul.mubr.bf16.vlgmr.msra.gmra.mrb[0].mxu0 %v2875_v9  ;;  %2580 = vmatpush3.bf16.msra.mxu1 %v2918_v44  ;;  %v2935_v9 = vld [vmem:[%s3714_s2 + $0x30] sm:$0xff]  }
  0x23   :  { %2586 = vmatpush3.bf16.msra.mxu0 %v2876_v10  ;;  %2601 = vmatprep.mubr.msk.bf16.mxu0 %vm3036_vm0, %v3035_v0  ;;  %v2936_v10 = vld [vmem:[%s3714_s2 + $0x38] sm:$0xff]  }
  0x24   :  { %2587 = vmatprep.subr.bf16.mxu0 %v3035_v0  ;;  %2605 = vmatprep.subr.bf16.mxu1 %v3035_v0 }
  0x25   :  { %2582 = vmatmul.mubr.bf16.vlgmr.msra.gmra.mrb[0].mxu1 %v2919_v46 }
  0x26   :  { %2606 = vmatpush3.bf16.msra.mxu1 %v2920_v47  ;;  %2621 = vmatprep.mubr.msk.bf16.mxu1 %vm3036_vm0, %v3035_v0 }
  0x27   :  { %2588 = vmatpush3.bf16.msra.mxu0 %v2877_v11  ;;  %2607 = vmatprep.subr.bf16.mxu1 %v3035_v0  ;;  %v2937_v11 = vld [vmem:[%s3715_s0 + $0x28] sm:$0xff]  }
  0x28   :  { %2589 = vmatprep.subr.bf16.mxu0 %v3035_v0 }
  0x2a   :  { %2608 = vmatpush3.bf16.msra.mxu1 %v2921_v49 }
  0x2b   :  { %2590 = vmatpush3.bf16.msra.mxu0 %v2878_v12  ;;  %2609 = vmatprep.subr.bf16.mxu1 %v3035_v0  ;;  %v2938_v12 = vld [vmem:[%s3714_s2] sm:$0xff]  }
  0x2c   :  { %2591 = vmatprep.subr.bf16.mxu0 %v3035_v0 }
  0x2e   :  { %2610 = vmatpush3.bf16.msra.mxu1 %v2922_v51  ;;  %v2955_v51 = vld [vmem:[%s3716_s4] sm:$0xff]  }
  0x2f   :  { %2592 = vmatpush3.bf16.msra.mxu0 %v2879_v13  ;;  %2611 = vmatprep.subr.bf16.mxu1 %v3035_v0  ;;  %v2939_v13 = vld [vmem:[%s3714_s2 + $0x8] sm:$0xff]  }
  0x30   :  { %2593 = vmatprep.subr.bf16.mxu0 %v3035_v0 }
  0x32   :  { %2612 = vmatpush3.bf16.msra.mxu1 %v2923_v53  ;;  %v2957_v53 = vld [vmem:[%s3716_s4 + $0x10] sm:$0xff]  }
  0x33   :  { %2594 = vmatpush3.bf16.msra.mxu0 %v2880_v15  ;;  %2613 = vmatprep.subr.bf16.mxu1 %v3035_v0  ;;  %v2941_v15 = vld [vmem:[%s3714_s2 + $0x18] sm:$0xff]  }
  0x34   :  { %2595 = vmatprep.subr.bf16.mxu0 %v3035_v0 }
  0x36   :  { %2614 = vmatpush3.bf16.msra.mxu1 %v2924_v56 }
  0x37   :  { %2596 = vmatpush3.bf16.msra.mxu0 %v2881_v17  ;;  %2615 = vmatprep.subr.bf16.mxu1 %v3035_v0  ;;  %v2943_v17 = vld [vmem:[%s3714_s2 + $0x28] sm:$0xff]  }
  0x38   :  { %2597 = vmatprep.subr.bf16.mxu0 %v3035_v0 }
  0x3a   :  { %2616 = vmatpush3.bf16.msra.mxu1 %v2925_v58 }
  0x3b   :  { %2598 = vmatpush3.bf16.msra.mxu0 %v2882_v19  ;;  %2617 = vmatprep.subr.bf16.mxu1 %v3035_v0  ;;  %v2945_v19 = vld [vmem:[%s3714_s2 + $0x38] sm:$0xff]  }
  0x3c   :  { %2599 = vmatprep.subr.bf16.mxu0 %v3035_v0 }
  0x3e   :  { %2618 = vmatpush3.bf16.msra.mxu1 %v2926_v59 }
  0x3f   :  { %2600 = vmatpush3.bf16.msra.mxu0 %v2883_v21  ;;  %2619 = vmatprep.subr.bf16.mxu1 %v3035_v0  ;;  %v2947_v21 = vld [vmem:[%s3716_s4] sm:$0xff]  }
  0x40   :  { %2625 = vmatprep.subr.bf16.mxu0 %v3035_v0 }
  0x42   :  { %2602 = vmatmul.mubr.bf16.vlgmr.msra.gmra.mrb[4].mxu0 %v2884_v22  ;;  %2620 = vmatpush3.bf16.msra.mxu1 %v2927_v1  ;;  %v2948_v22 = vld [vmem:[%s3716_s4 + $0x8] sm:$0xff]  }
  0x43   :  { %2626 = vmatpush3.bf16.msra.mxu0 %v2885_v23  ;;  %2641 = vmatprep.mubr.msk.bf16.mxu0 %vm3036_vm0, %v3035_v0  ;;  %v2949_v23 = vld [vmem:[%s3716_s4 + $0x10] sm:$0xff]  }
  0x44   :  { %2627 = vmatprep.subr.bf16.mxu0 %v3035_v0  ;;  %2645 = vmatprep.subr.bf16.mxu1 %v3035_v0 }
  0x45   :  { %2622 = vmatmul.mubr.bf16.vlgmr.msra.gmra.mrb[4].mxu1 %v2928_v2 }
  0x46   :  { %2646 = vmatpush3.bf16.msra.mxu1 %v2929_v3  ;;  %2661 = vmatprep.mubr.msk.bf16.mxu1 %vm3036_vm0, %v3035_v0 }
  0x47   :  { %2628 = vmatpush3.bf16.msra.mxu0 %v2886_v24  ;;  %2647 = vmatprep.subr.bf16.mxu1 %v3035_v0  ;;  %v2950_v24 = vld [vmem:[%s3716_s4 + $0x18] sm:$0xff]  }
  0x48   :  { %2629 = vmatprep.subr.bf16.mxu0 %v3035_v0 }
  0x4a   :  { %2648 = vmatpush3.bf16.msra.mxu1 %v2930_v4 }
  0x4b   :  { %2630 = vmatpush3.bf16.msra.mxu0 %v2887_v25  ;;  %2649 = vmatprep.subr.bf16.mxu1 %v3035_v0  ;;  %v3427_v25 = vld [vmem:[%s3718_s3] ss:$0 sm:$0xff] }
  0x4c   :  { %2631 = vmatprep.subr.bf16.mxu0 %v3035_v0 }
  0x4e   :  { %2650 = vmatpush3.bf16.msra.mxu1 %v2931_v5 }
  0x4f   :  { %2632 = vmatpush3.bf16.msra.mxu0 %v2888_v26  ;;  %2651 = vmatprep.subr.bf16.mxu1 %v3035_v0 }
  0x50   :  { %2633 = vmatprep.subr.bf16.mxu0 %v3035_v0 }
  0x52   :  { %2652 = vmatpush3.bf16.msra.mxu1 %v2932_v6 }
  0x53   :  { %2634 = vmatpush3.bf16.msra.mxu0 %v2889_v27  ;;  %2653 = vmatprep.subr.bf16.mxu1 %v3035_v0 }
  0x54   :  { %2635 = vmatprep.subr.bf16.mxu0 %v3035_v0 }
  0x56   :  { %2654 = vmatpush3.bf16.msra.mxu1 %v2933_v7 }
  0x57   :  { %2636 = vmatpush3.bf16.msra.mxu0 %v2890_v28  ;;  %2655 = vmatprep.subr.bf16.mxu1 %v3035_v0 }
  0x58   :  { %2637 = vmatprep.subr.bf16.mxu0 %v3035_v0 }
  0x5a   :  { %2656 = vmatpush3.bf16.msra.mxu1 %v2934_v8 }
  0x5b   :  { %2638 = vmatpush3.bf16.msra.mxu0 %v2891_v29  ;;  %2657 = vmatprep.subr.bf16.mxu1 %v3035_v0  ;;  %v2951_v29 = vld [vmem:[%s3716_s4 + $0x20] sm:$0xff]  }
  0x5c   :  { %2639 = vmatprep.subr.bf16.mxu0 %v3035_v0 }
  0x5e   :  { %2658 = vmatpush3.bf16.msra.mxu1 %v2935_v9 }
  0x5f   :  { %2640 = vmatpush3.bf16.msra.mxu0 %v2892_v30  ;;  %2659 = vmatprep.subr.bf16.mxu1 %v3035_v0 }
  0x60   :  { %2665 = vmatprep.subr.bf16.mxu0 %v3035_v0 }
  0x62   :  { %2642 = vmatmul.mubr.bf16.vlgmr.msra.gmra.mrb[8].mxu0 %v2893_v31  ;;  %2660 = vmatpush3.bf16.msra.mxu1 %v2936_v10 }
  0x63   :  { %2666 = vmatpush3.bf16.msra.mxu0 %v2894_v32  ;;  %2681 = vmatprep.mubr.msk.bf16.mxu0 %vm3036_vm0, %v3035_v0 }
  0x64   :  { %2667 = vmatprep.subr.bf16.mxu0 %v3035_v0  ;;  %2685 = vmatprep.subr.bf16.mxu1 %v3035_v0 }
  0x65   :  { %2662 = vmatmul.mubr.bf16.vlgmr.msra.gmra.mrb[8].mxu1 %v2937_v11 }
  0x66   :  { %2686 = vmatpush3.bf16.msra.mxu1 %v2938_v12  ;;  %2701 = vmatprep.mubr.msk.bf16.mxu1 %vm3036_vm0, %v3035_v0 }
  0x67   :  { %2668 = vmatpush3.bf16.msra.mxu0 %v2895_v33  ;;  %2687 = vmatprep.subr.bf16.mxu1 %v3035_v0 }
  0x68   :  { %2669 = vmatprep.subr.bf16.mxu0 %v3035_v0 }
  0x6a   :  { %2688 = vmatpush3.bf16.msra.mxu1 %v2939_v13 }
  0x6b   :  { %2670 = vmatpush3.bf16.msra.mxu0 %v2896_v34  ;;  %2689 = vmatprep.subr.bf16.mxu1 %v3035_v0  ;;  %v2952_v34 = vld [vmem:[%s3716_s4 + $0x28] sm:$0xff]  }
  0x6c   :  { %2671 = vmatprep.subr.bf16.mxu0 %v3035_v0 }
  0x6e   :  { %2690 = vmatpush3.bf16.msra.mxu1 %v2940_v14 }
  0x6f   :  { %2672 = vmatpush3.bf16.msra.mxu0 %v2897_v35  ;;  %2691 = vmatprep.subr.bf16.mxu1 %v3035_v0  ;;  %v2953_v35 = vld [vmem:[%s3716_s4 + $0x30] sm:$0xff]  }
  0x70   :  { %2673 = vmatprep.subr.bf16.mxu0 %v3035_v0 }
  0x72   :  { %2692 = vmatpush3.bf16.msra.mxu1 %v2941_v15 }
  0x73   :  { %2674 = vmatpush3.bf16.msra.mxu0 %v2898_v36  ;;  %2693 = vmatprep.subr.bf16.mxu1 %v3035_v0  ;;  %v2954_v36 = vld [vmem:[%s3716_s4 + $0x38] sm:$0xff]  }
  0x74   :  { %2675 = vmatprep.subr.bf16.mxu0 %v3035_v0 }
  0x76   :  { %2694 = vmatpush3.bf16.msra.mxu1 %v2942_v16 }
  0x77   :  { %2676 = vmatpush3.bf16.msra.mxu0 %v2899_v37  ;;  %2695 = vmatprep.subr.bf16.mxu1 %v3035_v0 }
  0x78   :  { %2677 = vmatprep.subr.bf16.mxu0 %v3035_v0 }
  0x7a   :  { %2696 = vmatpush3.bf16.msra.mxu1 %v2943_v17 }
  0x7b   :  { %2678 = vmatpush3.bf16.msra.mxu0 %v2900_v39  ;;  %2697 = vmatprep.subr.bf16.mxu1 %v3035_v0 }
  0x7c   :  { %2679 = vmatprep.subr.bf16.mxu0 %v3035_v0 }
  0x7e   :  { %2698 = vmatpush3.bf16.msra.mxu1 %v2944_v18 }
  0x7f   :  { %2680 = vmatpush3.bf16.msra.mxu0 %v2901_v42  ;;  %2699 = vmatprep.subr.bf16.mxu1 %v3035_v0 }
  0x80   :  { %2705 = vmatprep.subr.bf16.mxu0 %v3035_v0 }
  0x82   :  { %2682 = vmatmul.mubr.bf16.vlgmr.msra.gmra.mrb[12].mxu0 %v2902_v43  ;;  %2700 = vmatpush3.bf16.msra.mxu1 %v2945_v19 }
  0x83   :  { %2706 = vmatpush3.bf16.msra.mxu0 %v2903_v45  ;;  %2721 = vmatprep.mubr.msk.bf16.mxu0 %vm3036_vm0, %v3035_v0 }
  0x84   :  { %2707 = vmatprep.subr.bf16.mxu0 %v3035_v0  ;;  %2725 = vmatprep.subr.bf16.mxu1 %v3035_v0 }
  0x85   :  { %2702 = vmatmul.mubr.bf16.vlgmr.msra.gmra.mrb[12].mxu1 %v2946_v20 }
  0x86   :  { %2726 = vmatpush3.bf16.msra.mxu1 %v2947_v21  ;;  %2741 = vmatprep.mubr.msk.bf16.mxu1 %vm3036_vm0, %v3035_v0 }
  0x87   :  { %2708 = vmatpush3.bf16.msra.mxu0 %v2904_v48  ;;  %2727 = vmatprep.subr.bf16.mxu1 %v3035_v0 }
  0x88   :  { %2709 = vmatprep.subr.bf16.mxu0 %v3035_v0 }
  0x8a   :  { %2728 = vmatpush3.bf16.msra.mxu1 %v2948_v22 }
  0x8b   :  { %2710 = vmatpush3.bf16.msra.mxu0 %v2905_v50  ;;  %2729 = vmatprep.subr.bf16.mxu1 %v3035_v0 }
  0x8c   :  { %2711 = vmatprep.subr.bf16.mxu0 %v3035_v0 }
  0x8e   :  { %2730 = vmatpush3.bf16.msra.mxu1 %v2949_v23 }
  0x8f   :  { %2712 = vmatpush3.bf16.msra.mxu0 %v2906_v52  ;;  %2731 = vmatprep.subr.bf16.mxu1 %v3035_v0  ;;  %v2956_v52 = vld [vmem:[%s3716_s4 + $0x8] sm:$0xff]  }
  0x90   :  { %2713 = vmatprep.subr.bf16.mxu0 %v3035_v0 }
  0x92   :  { %2732 = vmatpush3.bf16.msra.mxu1 %v2950_v24 }
  0x93   :  { %2714 = vmatpush3.bf16.msra.mxu0 %v2907_v54  ;;  %2733 = vmatprep.subr.bf16.mxu1 %v3035_v0  ;;  %v2958_v54 = vld [vmem:[%s3716_s4 + $0x18] sm:$0xff]  }
  0x94   :  { %2715 = vmatprep.subr.bf16.mxu0 %v3035_v0 }
  0x96   :  { %2734 = vmatpush3.bf16.msra.mxu1 %v2951_v29 }
  0x97   :  { %2716 = vmatpush3.bf16.msra.mxu0 %v2908_v55  ;;  %2735 = vmatprep.subr.bf16.mxu1 %v3035_v0 }
  0x98   :  { %2717 = vmatprep.subr.bf16.mxu0 %v3035_v0 }
  0x9a   :  { %2736 = vmatpush3.bf16.msra.mxu1 %v2952_v34 }
  0x9b   :  { %2718 = vmatpush3.bf16.msra.mxu0 %v2909_v57  ;;  %2737 = vmatprep.subr.bf16.mxu1 %v3035_v0 }
  0x9c   :  { %2719 = vmatprep.subr.bf16.mxu0 %v3035_v0 }
  0x9e   :  { %2738 = vmatpush3.bf16.msra.mxu1 %v2953_v35 }
  0x9f   :  { %2720 = vmatpush3.bf16.msra.mxu0 %v2910_v60  ;;  %2739 = vmatprep.subr.bf16.mxu1 %v3035_v0 }
  0xa0   :  { %2745 = vmatprep.subr.bf16.mxu0 %v3035_v0 }
  0xa2   :  { %2722 = vmatmul.mubr.bf16.vlgmr.msra.gmra.mrb[16].mxu0 %v1036_v63  ;;  %2740 = vmatpush3.bf16.msra.mxu1 %v2954_v36 }
  0xa3   :  { %2761 = vmatprep.mubr.msk.bf16.mxu0 %vm3036_vm0, %v3035_v0  ;;  %2765 = vmatprep.subr.bf16.mxu1 %v3035_v0 }
  0xa4   :  { %2746 = vmatpush3.bf16.msra.mxu0 %v2955_v51 }
  0xa5   :  { %2747 = vmatprep.subr.bf16.mxu0 %v3035_v0 }
  0xa8   :  { %2748 = vmatpush3.bf16.msra.mxu0 %v2956_v52 }
  0xa9   :  { %2749 = vmatprep.subr.bf16.mxu0 %v3035_v0 }
  0xac   :  { %2750 = vmatpush3.bf16.msra.mxu0 %v2957_v53 }
  0xad   :  { %2751 = vmatprep.subr.bf16.mxu0 %v3035_v0 }
  0xb0   :  { %2752 = vmatpush3.bf16.msra.mxu0 %v2958_v54 }
  0xb1   :  { %2753 = vmatprep.subr.bf16.mxu0 %v3035_v0 }
  0xf5   :  { %v142_v26 = vpop.f32.mrb[0].mxu0 }
  0xf6   :  { %v143_v27 = vadd.f32 %v3427_v25, %v142_v26  ;;  %v2563_v28 = vpop.f32.mrb[1].mxu0 }
  0xf7   :  { %v145_v30 = vpop.f32.mrb[2].mxu0 }
  0xf8   :  { %v146_v31 = vadd.f32 %v3427_v25, %v145_v30  ;;  %v2564_v32 = vpop.f32.mrb[3].mxu0  ;;  %v266_v61 = vpop.f32.mrb[0].mxu1 }
  0xf9   :  { %v267_v62 = vadd.f32 %v3427_v25, %v266_v61  ;;  %v2583_v63 = vpop.f32.mrb[1].mxu1  ;;  %v2969_v61 = vld [vmem:[%s3716_s4 + $0x30] sm:$0xff]  }
  0xfa   :  { %v2271_v33 = vpack.c.bf16 %v146_v31, %v143_v27  ;;  %v269_v2 = vpop.f32.mrb[2].mxu1  ;;  %v2971_v63 = vld [vmem:[%s3716_s4] sm:$0xff]  }
  0xfb   :  { %v270_v3 = vadd.f32 %v3427_v25, %v269_v2  ;;  %v2584_v4 = vpop.f32.mrb[3].mxu1  ;;  %v2972_v2 = vld [vmem:[%s3716_s4 + $0x8] sm:$0xff]  }
  0xfc   :  { %v2310_v6 = vunpack.c.l.bf16 %v2271_v33  ;;  %v2311_v10 = vunpack.c.h.bf16 %v2271_v33  ;;  %v2974_v4 = vld [vmem:[%s3716_s4 + $0x18] sm:$0xff]  }
  0xfd   :  { %v3478_v5 = vpack.c.bf16 %v270_v3, %v267_v62  ;;  %v2970_v62 = vld [vmem:[%s3716_s4 + $0x38] sm:$0xff]   ;;  %v2973_v3 = vld [vmem:[%s3716_s4 + $0x10] sm:$0xff]  }
  0xff   :  { %v2320_v52 = vunpack.c.h.bf16 %v3478_v5 }
 0x115   :  { %v391_v37 = vpop.f32.mrb[4].mxu0 }
 0x116   :  { %v392_v38 = vadd.f32 %v3427_v25, %v391_v37  ;;  %v2603_v39 = vpop.f32.mrb[5].mxu0 }
 0x117   :  { %v394_v40 = vpop.f32.mrb[6].mxu0  ;;  %v2959_v39 = vld [vmem:[%s3716_s4 + $0x20] sm:$0xff]  }
 0x118   :  { %v395_v41 = vadd.f32 %v3427_v25, %v394_v40  ;;  %v2604_v42 = vpop.f32.mrb[7].mxu0  ;;  %v516_v14 = vpop.f32.mrb[4].mxu1  ;;  %2754 = vmatpush3.bf16.msra.mxu0 %v2959_v39  ;;  %v2960_v40 = vld [vmem:[%s3716_s4 + $0x28] sm:$0xff]   ;;  %v2985_v39 = vld [vmem:[%s3716_s4 + $0x30] sm:$0xff]  }
 0x119   :  { %v517_v15 = vadd.f32 %v3427_v25, %v516_v14  ;;  %v2623_v16 = vpop.f32.mrb[5].mxu1  ;;  %2755 = vmatprep.subr.bf16.mxu0 %v3035_v0  ;;  %v2963_v42 = vld [vmem:[%s3716_s4] sm:$0xff]  }
 0x11a   :  { %v3450_v43 = vpack.c.bf16 %v395_v41, %v392_v38  ;;  %v519_v17 = vpop.f32.mrb[6].mxu1  ;;  %v2961_v41 = vld [vmem:[%s3716_s4 + $0x30] sm:$0xff]   ;;  %v2976_v16 = vld [vmem:[%s3716_s4 + $0x28] sm:$0xff]  }
 0x11b   :  { %v520_v18 = vadd.f32 %v3427_v25, %v519_v17  ;;  %v2624_v19 = vpop.f32.mrb[7].mxu1  ;;  %v2977_v17 = vld [vmem:[%s3716_s4 + $0x30] sm:$0xff]  }
 0x11c   :  { %2756 = vmatpush3.bf16.msra.mxu0 %v2960_v40  ;;  %v2979_v19 = vld [vmem:[%s3716_s4] sm:$0xff]   ;;  %v2986_v40 = vld [vmem:[%s3716_s4 + $0x38] sm:$0xff]  }
 0x11d   :  { %v3482_v20 = vpack.c.bf16 %v520_v18, %v517_v15  ;;  %2757 = vmatprep.subr.bf16.mxu0 %v3035_v0  ;;  %v2978_v18 = vld [vmem:[%s3716_s4 + $0x38] sm:$0xff]  }
 0x120   :  { %2758 = vmatpush3.bf16.msra.mxu0 %v2961_v41  ;;  %v2987_v41 = vld [vmem:[%s3716_s4] sm:$0xff]  }
 0x121   :  { %2759 = vmatprep.subr.bf16.mxu0 %v3035_v0 }
 0x135   :  { %v641_v44 = vpop.f32.mrb[8].mxu0 }
 0x136   :  { %v642_v45 = vadd.f32 %v3427_v25, %v641_v44  ;;  %v2643_v46 = vpop.f32.mrb[9].mxu0  ;;  %v2964_v44 = vld [vmem:[%s3716_s4 + $0x8] sm:$0xff]  }
 0x137   :  { %v644_v47 = vpop.f32.mrb[10].mxu0  ;;  %v2966_v46 = vld [vmem:[%s3716_s4 + $0x18] sm:$0xff]  }
 0x138   :  { %v645_v48 = vadd.f32 %v3427_v25, %v644_v47  ;;  %v2644_v49 = vpop.f32.mrb[11].mxu0  ;;  %v766_v24 = vpop.f32.mrb[8].mxu1  ;;  %v2319_v47 = vunpack.c.l.bf16 %v3478_v5  ;;  %v2328_v5 = vunpack.c.l.bf16 %v3450_v43 }
 0x139   :  { %v767_v26 = vadd.f32 %v3427_v25, %v766_v24  ;;  %v2663_v27 = vpop.f32.mrb[9].mxu1  ;;  %v2337_v24 = vunpack.c.l.bf16 %v3482_v20 }
 0x13a   :  { %v3454_v50 = vpack.c.bf16 %v645_v48, %v642_v45  ;;  %v769_v28 = vpop.f32.mrb[10].mxu1  ;;  %v2965_v45 = vld [vmem:[%s3716_s4 + $0x10] sm:$0xff]  }
 0x13b   :  { %v770_v29 = vadd.f32 %v3427_v25, %v769_v28  ;;  %v2664_v30 = vpop.f32.mrb[11].mxu1 }
 0x13d   :  { %v3491_v31 = vpack.c.bf16 %v770_v29, %v767_v26  ;;  %v2338_v29 = vunpack.c.h.bf16 %v3482_v20  ;;  %v2983_v20 = vld [vmem:[%s3716_s4 + $0x20] sm:$0xff]  }
 0x155   :  { %v891_v55 = vpop.f32.mrb[12].mxu0 }
 0x156   :  { %v892_v56 = vadd.f32 %v3427_v25, %v891_v55  ;;  %v2683_v57 = vpop.f32.mrb[13].mxu0 }
 0x157   :  { %v894_v58 = vpop.f32.mrb[14].mxu0 }
 0x158   :  { %v895_v59 = vadd.f32 %v3427_v25, %v894_v58  ;;  %v2684_v60 = vpop.f32.mrb[15].mxu0  ;;  %v1016_v32 = vpop.f32.mrb[12].mxu1 }
 0x159   :  { %v1017_v33 = vadd.f32 %v3427_v25, %v1016_v32  ;;  %v2703_v34 = vpop.f32.mrb[13].mxu1  ;;  %v2968_v60 = vld [vmem:[%s3716_s4 + $0x28] sm:$0xff]  }
 0x15a   :  { %v3475_v1 = vpack.c.bf16 %v895_v59, %v892_v56  ;;  %v1019_v35 = vpop.f32.mrb[14].mxu1  ;;  %v2967_v59 = vld [vmem:[%s3716_s4 + $0x20] sm:$0xff]  }
 0x15b   :  { %v1020_v36 = vadd.f32 %v3427_v25, %v1019_v35  ;;  %v2704_v37 = vpop.f32.mrb[15].mxu1  ;;  %v2962_v25 = vld [vmem:[%s3716_s4 + $0x38] sm:$0xff]  }
 0x15c   :  { %2760 = vmatpush3.bf16.msra.mxu0 %v2962_v25  ;;  %v2984_v37 = vld [vmem:[%s3716_s4 + $0x28] sm:$0xff]  }
 0x15d   :  { %v3495_v38 = vpack.c.bf16 %v1020_v36, %v1017_v33  ;;  %2785 = vmatprep.subr.bf16.mxu0 %v3035_v0  ;;  %v2988_v25 = vld [vmem:[%s3716_s4 + $0x8] sm:$0xff]  }
 0x175   :  { %v1139_v7 = vpop.f32.mrb[16].mxu0 }
 0x176   :  { %v1140_v8 = vadd.f32 %v2310_v6, %v1139_v7  ;;  %v2723_v9 = vpop.f32.mrb[17].mxu0 }
 0x177   :  { %v1142_v11 = vpop.f32.mrb[18].mxu0  ;;  %v2329_v9 = vunpack.c.h.bf16 %v3450_v43  ;;  %v2975_v43 = vld [vmem:[%s3716_s4 + $0x20] sm:$0xff]  }
 0x178   :  { %v1143_v12 = vadd.f32 %v2311_v10, %v1142_v11  ;;  %v2724_v13 = vpop.f32.mrb[19].mxu0  ;;  %3003 = vtanh.f32 %v1140_v8 }
 0x17a   :  { %3005 = vtanh.f32 %v1143_v12 }
 0x182   :  { %v3004_v21 = vpop.eup %3003 }
 0x184   :  { %v3006_v22 = vpop.eup %3005 }
 0x185   :  { %v1148_v23 = vpack.c.bf16 %v3006_v22, %v3004_v21  ;;  %v2980_v21 = vld [vmem:[%s3716_s4 + $0x8] sm:$0xff]   ;;  %v2981_v22 = vld [vmem:[%s3716_s4 + $0x10] sm:$0xff]  }
 0x187   :  { %2316 = vst [vmem:[%s3719_s5] sm:$0xff] %v1148_v23   ;;  %2742 = vmatmul.mubr.bf16.vlgmr.msra.gmra.mrb[16].mxu1 %v1148_v23  ;;  %v2982_v23 = vld [vmem:[%s3716_s4 + $0x18] sm:$0xff]  }
 0x188   :  { %2781 = vmatprep.mubr.msk.bf16.mxu1 %vm3036_vm0, %v3035_v0  ;;  %2766 = vmatpush3.bf16.msra.mxu1 %v2963_v42  ;;  %v2989_v42 = vld [vmem:[%s3716_s4 + $0x10] sm:$0xff]  }
 0x189   :  { %2767 = vmatprep.subr.bf16.mxu1 %v3035_v0 }
 0x18c   :  { %2768 = vmatpush3.bf16.msra.mxu1 %v2964_v44  ;;  %v2990_v44 = vld [vmem:[%s3716_s4 + $0x18] sm:$0xff]  }
 0x18d   :  { %2769 = vmatprep.subr.bf16.mxu1 %v3035_v0 }
 0x190   :  { %2770 = vmatpush3.bf16.msra.mxu1 %v2965_v45  ;;  %v2346_v45 = vunpack.c.l.bf16 %v3454_v50 }
 0x191   :  { %2771 = vmatprep.subr.bf16.mxu1 %v3035_v0 }
 0x194   :  { %2772 = vmatpush3.bf16.msra.mxu1 %v2966_v46 }
 0x195   :  { %2773 = vmatprep.subr.bf16.mxu1 %v3035_v0 }
 0x198   :  { %2774 = vmatpush3.bf16.msra.mxu1 %v2967_v59  ;;  %v2994_v59 = vld [vmem:[%s3716_s4 + $0x38] sm:$0xff]  }
 0x199   :  { %2775 = vmatprep.subr.bf16.mxu1 %v3035_v0 }
 0x19c   :  { %2776 = vmatpush3.bf16.msra.mxu1 %v2968_v60  ;;  %v2995_v60 = vld [vmem:[%s3716_s4] sm:$0xff]  }
 0x19d   :  { %2777 = vmatprep.subr.bf16.mxu1 %v3035_v0 }
 0x1a0   :  { %2778 = vmatpush3.bf16.msra.mxu1 %v2969_v61  ;;  %v2996_v61 = vld [vmem:[%s3716_s4 + $0x8] sm:$0xff]  }
 0x1a1   :  { %2779 = vmatprep.subr.bf16.mxu1 %v3035_v0 }
 0x1a4   :  { %2780 = vmatpush3.bf16.msra.mxu1 %v2970_v62  ;;  %v2997_v62 = vld [vmem:[%s3716_s4 + $0x10] sm:$0xff]  }
 0x1a5   :  { %2805 = vmatprep.subr.bf16.mxu1 %v3035_v0 }
 0x25a   :  { %v1260_v48 = vpop.f32.mrb[16].mxu1 }
 0x25b   :  { %v1261_v49 = vadd.f32 %v2319_v47, %v1260_v48  ;;  %v2743_v51 = vpop.f32.mrb[17].mxu1 }
 0x25c   :  { %v1263_v53 = vpop.f32.mrb[18].mxu1 }
 0x25d   :  { %v1264_v54 = vadd.f32 %v2320_v52, %v1263_v53  ;;  %v2744_v55 = vpop.f32.mrb[19].mxu1  ;;  %3007 = vtanh.f32 %v1261_v49  ;;  %v2347_v49 = vunpack.c.h.bf16 %v3454_v50  ;;  %v2991_v50 = vld [vmem:[%s3716_s4 + $0x20] sm:$0xff]  }
 0x25f   :  { %3009 = vtanh.f32 %v1264_v54 }
 0x267   :  { %v3008_v56 = vpop.eup %3007 }
 0x269   :  { %v3010_v57 = vpop.eup %3009 }
 0x26a   :  { %v1269_v58 = vpack.c.bf16 %v3010_v57, %v3008_v56  ;;  %v2992_v57 = vld [vmem:[%s3716_s4 + $0x28] sm:$0xff]  }
 0x26c   :  { %2388 = vst [vmem:[%s3719_s5 + $0x8] sm:$0xff] %v1269_v58   ;;  %2762 = vmatmul.mubr.bf16.vlgmr.msra.gmra.mrb[20].mxu0 %v1269_v58  ;;  %v2993_v58 = vld [vmem:[%s3716_s4 + $0x30] sm:$0xff]  }
 0x26d   :  { %2801 = vmatprep.mubr.msk.bf16.mxu0 %vm3036_vm0, %v3035_v0  ;;  %2786 = vmatpush3.bf16.msra.mxu0 %v2971_v63  ;;  %v2998_v63 = vld [vmem:[%s3716_s4 + $0x18] sm:$0xff]  }
 0x26e   :  { %2787 = vmatprep.subr.bf16.mxu0 %v3035_v0 }
 0x271   :  { %2788 = vmatpush3.bf16.msra.mxu0 %v2972_v2  ;;  %v2355_v2 = vunpack.c.l.bf16 %v3491_v31 }
 0x272   :  { %2789 = vmatprep.subr.bf16.mxu0 %v3035_v0 }
 0x275   :  { %2790 = vmatpush3.bf16.msra.mxu0 %v2973_v3 }
 0x276   :  { %2791 = vmatprep.subr.bf16.mxu0 %v3035_v0 }
 0x279   :  { %2792 = vmatpush3.bf16.msra.mxu0 %v2974_v4 }
 0x27a   :  { %2793 = vmatprep.subr.bf16.mxu0 %v3035_v0 }
 0x27d   :  { %2794 = vmatpush3.bf16.msra.mxu0 %v2975_v43  ;;  %v2364_v43 = vunpack.c.l.bf16 %v3475_v1 }
 0x27e   :  { %2795 = vmatprep.subr.bf16.mxu0 %v3035_v0 }
 0x281   :  { %2796 = vmatpush3.bf16.msra.mxu0 %v2976_v16 }
 0x282   :  { %2797 = vmatprep.subr.bf16.mxu0 %v3035_v0 }
 0x285   :  { %2798 = vmatpush3.bf16.msra.mxu0 %v2977_v17 }
 0x286   :  { %2799 = vmatprep.subr.bf16.mxu0 %v3035_v0 }
 0x289   :  { %2800 = vmatpush3.bf16.msra.mxu0 %v2978_v18 }
 0x28a   :  { %2825 = vmatprep.subr.bf16.mxu0 %v3035_v0 }
 0x33f   :  { %v1381_v6 = vpop.f32.mrb[20].mxu0 }
 0x340   :  { %v1382_v7 = vadd.f32 %v2328_v5, %v1381_v6  ;;  %v2763_v8 = vpop.f32.mrb[21].mxu0  ;;  %v2356_v6 = vunpack.c.h.bf16 %v3491_v31  ;;  %v3000_v31 = vld [vmem:[%s3716_s4 + $0x28] sm:$0xff]  }
 0x341   :  { %v1384_v10 = vpop.f32.mrb[22].mxu0 }
 0x342   :  { %v1385_v11 = vadd.f32 %v2329_v9, %v1384_v10  ;;  %v2764_v12 = vpop.f32.mrb[23].mxu0  ;;  %3011 = vtanh.f32 %v1382_v7 }
 0x344   :  { %3013 = vtanh.f32 %v1385_v11 }
 0x34c   :  { %v3012_v13 = vpop.eup %3011 }
 0x34e   :  { %v3014_v14 = vpop.eup %3013 }
 0x34f   :  { %v1390_v15 = vpack.c.bf16 %v3014_v14, %v3012_v13  ;;  %v2999_v13 = vld [vmem:[%s3716_s4 + $0x20] sm:$0xff]   ;;  %v3001_v14 = vld [vmem:[%s3716_s4 + $0x30] sm:$0xff]  }
 0x351   :  { %2390 = vst [vmem:[%s3719_s5 + $0x10] sm:$0xff] %v1390_v15   ;;  %2782 = vmatmul.mubr.bf16.vlgmr.msra.gmra.mrb[20].mxu1 %v1390_v15  ;;  %v3002_v15 = vld [vmem:[%s3716_s4 + $0x38] sm:$0xff]  }
 0x352   :  { %2821 = vmatprep.mubr.msk.bf16.mxu1 %vm3036_vm0, %v3035_v0  ;;  %2806 = vmatpush3.bf16.msra.mxu1 %v2979_v19  ;;  %v2365_v19 = vunpack.c.h.bf16 %v3475_v1  ;;  %v2374_v1 = vunpack.c.h.bf16 %v3495_v38 }
 0x353   :  { %2807 = vmatprep.subr.bf16.mxu1 %v3035_v0 }
 0x356   :  { %2808 = vmatpush3.bf16.msra.mxu1 %v2980_v21 }
 0x357   :  { %2809 = vmatprep.subr.bf16.mxu1 %v3035_v0 }
 0x35a   :  { %2810 = vmatpush3.bf16.msra.mxu1 %v2981_v22 }
 0x35b   :  { %2811 = vmatprep.subr.bf16.mxu1 %v3035_v0 }
 0x35e   :  { %2812 = vmatpush3.bf16.msra.mxu1 %v2982_v23 }
 0x35f   :  { %2813 = vmatprep.subr.bf16.mxu1 %v3035_v0 }
 0x362   :  { %2814 = vmatpush3.bf16.msra.mxu1 %v2983_v20 }
 0x363   :  { %2815 = vmatprep.subr.bf16.mxu1 %v3035_v0 }
 0x366   :  { %2816 = vmatpush3.bf16.msra.mxu1 %v2984_v37 }
 0x367   :  { %2817 = vmatprep.subr.bf16.mxu1 %v3035_v0 }
 0x36a   :  { %2818 = vmatpush3.bf16.msra.mxu1 %v2985_v39 }
 0x36b   :  { %2819 = vmatprep.subr.bf16.mxu1 %v3035_v0 }
 0x36e   :  { %2820 = vmatpush3.bf16.msra.mxu1 %v2986_v40 }
 0x36f   :  { %2845 = vmatprep.subr.bf16.mxu1 %v3035_v0 }
 0x424   :  { %v1502_v26 = vpop.f32.mrb[20].mxu1 }
 0x425   :  { %v1503_v27 = vadd.f32 %v2337_v24, %v1502_v26  ;;  %v2783_v28 = vpop.f32.mrb[21].mxu1 }
 0x426   :  { %v1505_v30 = vpop.f32.mrb[22].mxu1 }
 0x427   :  { %v1506_v32 = vadd.f32 %v2338_v29, %v1505_v30  ;;  %v2784_v33 = vpop.f32.mrb[23].mxu1  ;;  %3015 = vtanh.f32 %v1503_v27 }
 0x429   :  { %3017 = vtanh.f32 %v1506_v32 }
 0x431   :  { %v3016_v34 = vpop.eup %3015 }
 0x433   :  { %v3018_v35 = vpop.eup %3017 }
 0x434   :  { %v1511_v36 = vpack.c.bf16 %v3018_v35, %v3016_v34 }
 0x436   :  { %2392 = vst [vmem:[%s3719_s5 + $0x18] sm:$0xff] %v1511_v36   ;;  %2802 = vmatmul.mubr.bf16.vlgmr.msra.gmra.mrb[24].mxu0 %v1511_v36 }
 0x437   :  { %2841 = vmatprep.mubr.msk.bf16.mxu0 %vm3036_vm0, %v3035_v0  ;;  %2826 = vmatpush3.bf16.msra.mxu0 %v2987_v41 }
 0x438   :  { %2827 = vmatprep.subr.bf16.mxu0 %v3035_v0 }
 0x43b   :  { %2828 = vmatpush3.bf16.msra.mxu0 %v2988_v25 }
 0x43c   :  { %2829 = vmatprep.subr.bf16.mxu0 %v3035_v0 }
 0x43f   :  { %2830 = vmatpush3.bf16.msra.mxu0 %v2989_v42 }
 0x440   :  { %2831 = vmatprep.subr.bf16.mxu0 %v3035_v0 }
 0x443   :  { %2832 = vmatpush3.bf16.msra.mxu0 %v2990_v44 }
 0x444   :  { %2833 = vmatprep.subr.bf16.mxu0 %v3035_v0 }
 0x447   :  { %2834 = vmatpush3.bf16.msra.mxu0 %v2991_v50 }
 0x448   :  { %2835 = vmatprep.subr.bf16.mxu0 %v3035_v0 }
 0x44b   :  { %2836 = vmatpush3.bf16.msra.mxu0 %v2992_v57 }
 0x44c   :  { %2837 = vmatprep.subr.bf16.mxu0 %v3035_v0 }
 0x44f   :  { %2838 = vmatpush3.bf16.msra.mxu0 %v2993_v58 }
 0x450   :  { %2839 = vmatprep.subr.bf16.mxu0 %v3035_v0 }
 0x453   :  { %2840 = vmatpush3.bf16.msra.mxu0 %v2994_v59 }
 0x509   :  { %v1623_v46 = vpop.f32.mrb[24].mxu0 }
 0x50a   :  { %v1624_v47 = vadd.f32 %v2346_v45, %v1623_v46  ;;  %v2803_v48 = vpop.f32.mrb[25].mxu0 }
 0x50b   :  { %v1626_v51 = vpop.f32.mrb[26].mxu0 }
 0x50c   :  { %v1627_v52 = vadd.f32 %v2347_v49, %v1626_v51  ;;  %v2804_v53 = vpop.f32.mrb[27].mxu0  ;;  %3019 = vtanh.f32 %v1624_v47 }
 0x50e   :  { %3021 = vtanh.f32 %v1627_v52 }
 0x516   :  { %v3020_v54 = vpop.eup %3019 }
 0x518   :  { %v3022_v55 = vpop.eup %3021 }
 0x519   :  { %v1632_v56 = vpack.c.bf16 %v3022_v55, %v3020_v54 }
 0x51b   :  { %2394 = vst [vmem:[%s3719_s5 + $0x20] sm:$0xff] %v1632_v56   ;;  %2822 = vmatmul.mubr.bf16.vlgmr.msra.gmra.mrb[24].mxu1 %v1632_v56 }
 0x51c   :  { %2861 = vmatprep.mubr.msk.bf16.mxu1 %vm3036_vm0, %v3035_v0  ;;  %2846 = vmatpush3.bf16.msra.mxu1 %v2995_v60 }
 0x51d   :  { %2847 = vmatprep.subr.bf16.mxu1 %v3035_v0 }
 0x520   :  { %2848 = vmatpush3.bf16.msra.mxu1 %v2996_v61 }
 0x521   :  { %2849 = vmatprep.subr.bf16.mxu1 %v3035_v0 }
 0x524   :  { %2850 = vmatpush3.bf16.msra.mxu1 %v2997_v62 }
 0x525   :  { %2851 = vmatprep.subr.bf16.mxu1 %v3035_v0 }
 0x528   :  { %2852 = vmatpush3.bf16.msra.mxu1 %v2998_v63 }
 0x529   :  { %2853 = vmatprep.subr.bf16.mxu1 %v3035_v0 }
 0x52c   :  { %2854 = vmatpush3.bf16.msra.mxu1 %v2999_v13 }
 0x52d   :  { %2855 = vmatprep.subr.bf16.mxu1 %v3035_v0 }
 0x530   :  { %2856 = vmatpush3.bf16.msra.mxu1 %v3000_v31 }
 0x531   :  { %2857 = vmatprep.subr.bf16.mxu1 %v3035_v0 }
 0x534   :  { %2858 = vmatpush3.bf16.msra.mxu1 %v3001_v14 }
 0x535   :  { %2859 = vmatprep.subr.bf16.mxu1 %v3035_v0  ;;  %v2373_v0 = vunpack.c.l.bf16 %v3495_v38 }
 0x538   :  { %2860 = vmatpush3.bf16.msra.mxu1 %v3002_v15 }
 0x5ee   :  { %v1744_v3 = vpop.f32.mrb[24].mxu1 }
 0x5ef   :  { %v1745_v4 = vadd.f32 %v2355_v2, %v1744_v3  ;;  %v2823_v5 = vpop.f32.mrb[25].mxu1 }
 0x5f0   :  { %v1747_v7 = vpop.f32.mrb[26].mxu1 }
 0x5f1   :  { %v1748_v8 = vadd.f32 %v2356_v6, %v1747_v7  ;;  %v2824_v9 = vpop.f32.mrb[27].mxu1  ;;  %3023 = vtanh.f32 %v1745_v4 }
 0x5f3   :  { %3025 = vtanh.f32 %v1748_v8 }
 0x5fb   :  { %v3024_v10 = vpop.eup %3023 }
 0x5fd   :  { %v3026_v11 = vpop.eup %3025 }
 0x5fe   :  { %v1753_v12 = vpack.c.bf16 %v3026_v11, %v3024_v10 }
 0x600   :  { %2396 = vst [vmem:[%s3719_s5 + $0x28] sm:$0xff] %v1753_v12   ;;  %2842 = vmatmul.mubr.bf16.vlgmr.msra.gmra.mrb[28].mxu0 %v1753_v12 }
 0x6d3   :  { %v1865_v16 = vpop.f32.mrb[28].mxu0 }
 0x6d4   :  { %v1866_v17 = vadd.f32 %v2364_v43, %v1865_v16  ;;  %v2843_v18 = vpop.f32.mrb[29].mxu0 }
 0x6d5   :  { %v1868_v21 = vpop.f32.mrb[30].mxu0 }
 0x6d6   :  { %v1869_v22 = vadd.f32 %v2365_v19, %v1868_v21  ;;  %v2844_v23 = vpop.f32.mrb[31].mxu0  ;;  %3027 = vtanh.f32 %v1866_v17 }
 0x6d8   :  { %3029 = vtanh.f32 %v1869_v22 }
 0x6e0   :  { %v3028_v24 = vpop.eup %3027 }
 0x6e2   :  { %v3030_v26 = vpop.eup %3029 }
 0x6e3   :  { %v1874_v27 = vpack.c.bf16 %v3030_v26, %v3028_v24 }
 0x6e5   :  { %2398 = vst [vmem:[%s3719_s5 + $0x30] sm:$0xff] %v1874_v27   ;;  %2862 = vmatmul.mubr.bf16.vlgmr.msra.gmra.mrb[28].mxu1 %v1874_v27 }
 0x7b8   :  { %v1986_v28 = vpop.f32.mrb[28].mxu1 }
 0x7b9   :  { %v1987_v29 = vadd.f32 %v2373_v0, %v1986_v28  ;;  %v2863_v30 = vpop.f32.mrb[29].mxu1 }
 0x7ba   :  { %v1989_v32 = vpop.f32.mrb[30].mxu1 }
 0x7bb   :  { %v1990_v33 = vadd.f32 %v2374_v1, %v1989_v32  ;;  %v2864_v34 = vpop.f32.mrb[31].mxu1  ;;  %3031 = vtanh.f32 %v1987_v29 }
 0x7bd   :  { %3033 = vtanh.f32 %v1990_v33 }
 0x7c5   :  { %v3032_v35 = vpop.eup %3031 }
 0x7c7   :  { %v3034_v36 = vpop.eup %3033 }
 0x7c8   :  { %v2378_v20 = vpack.c.bf16 %v3034_v36, %v3032_v35 }
 0x7ca   :  { %2400 = vst [vmem:[%s3719_s5 + $0x38] sm:$0xff] %v2378_v20  }

</bundles_post_ra>
